<compile_context>
chip_gen: v7x
topology: tpu7x:2x2x1
jax: 0.10.0
libtpu: 0.0.40
codegen_flags: <defaults>
</compile_context>

<pallas_src>
import jax
import jax.numpy as jnp
from jax.experimental import pallas as pl
from jax.experimental.pallas import tpu as pltpu

LAYER_SIZES = [784, 512, 256, 128, 64, 10]
PAD_HIDDEN = 128       # layer-4 output (and layer-5 input) padded 64 -> 128
PAD_OUT = 128          # last layer padded 10 -> 128 for lane-dense stores
MAX_TILE = 1024        # rows per grid step (upper bound)


def _round_up(x, m):
    return (x + m - 1) // m * m


def _choose_tile(n):
    """Batch tile: multiple of 16 (8 for tiny n), capped at MAX_TILE, and
    >=2 grid steps once n > 512 so v7x's two TensorCores both get work."""
    if n <= 16:
        return max(_round_up(n, 8), 8)
    n16 = _round_up(n, 16)
    if n16 <= 512:
        return n16                      # one step; >=0.6 µs MXU work already
    n_steps = max(2, pl.cdiv(n16, MAX_TILE))
    return _round_up(pl.cdiv(n16, n_steps), 16)


def _mlp_kernel(x_ref,
                w1, b1, w2, b2, w3, b3, w4, b4, w5, b5,
                o_ref):
    """Fused forward: 4x (matmul + bias + relu) + final matmul + bias.

    x arrives f32 and is cast to bf16 in-VMEM (VPU slack); weights are bf16;
    accumulation and biases are f32.
    """
    h = x_ref[...].astype(jnp.bfloat16)                              # [T, 784]
    h = jnp.maximum(
        jnp.dot(h, w1[...], preferred_element_type=jnp.float32) + b1[...],
        0.0).astype(jnp.bfloat16)
    h = jnp.maximum(
        jnp.dot(h, w2[...], preferred_element_type=jnp.float32) + b2[...],
        0.0).astype(jnp.bfloat16)
    h = jnp.maximum(
        jnp.dot(h, w3[...], preferred_element_type=jnp.float32) + b3[...],
        0.0).astype(jnp.bfloat16)
    h = jnp.maximum(
        jnp.dot(h, w4[...], preferred_element_type=jnp.float32) + b4[...],
        0.0).astype(jnp.bfloat16)
    o_ref[...] = (
        jnp.dot(h, w5[...], preferred_element_type=jnp.float32) + b5[...])


def init_params(key):
    """PyTorch-style uniform ±1/sqrt(fan_in) init.

    Weights stored as (in_features, out_features) bf16; biases (1, out) f32.
    Layer 4 is zero-padded to 128 output features, layer 5 to 128 input rows
    and 128 output features — exact zeros, so the math is unchanged; the extra
    logits are sliced off in the wrapper.
    """
    params = []
    n_layers = len(LAYER_SIZES) - 1
    for i in range(n_layers):
        fan_in, fan_out = LAYER_SIZES[i], LAYER_SIZES[i + 1]
        key, kw, kb = jax.random.split(key, 3)
        bound = 1.0 / (fan_in ** 0.5)
        w = jax.random.uniform(kw, (fan_in, fan_out), jnp.float32, -bound, bound)
        b = jax.random.uniform(kb, (1, fan_out), jnp.float32, -bound, bound)

        pad_in = PAD_HIDDEN - fan_in if i == n_layers - 1 else 0
        if i == n_layers - 2:                 # layer 4: 128 -> 64, pad to 128
            pad_out_f = PAD_HIDDEN - fan_out
        elif i == n_layers - 1:               # layer 5: 64 -> 10, pad to 128
            pad_out_f = PAD_OUT - fan_out
        else:
            pad_out_f = 0
        if pad_in or pad_out_f:
            w = jnp.pad(w, ((0, pad_in), (0, pad_out_f)))
            b = jnp.pad(b, ((0, 0), (0, pad_out_f)))

        params.extend([w.astype(jnp.bfloat16), b.astype(jnp.float32)])
    return params


@jax.jit
def net_forward(x_nchw, *params):
    n = x_nchw.shape[0]
    # x.view(-1, 784); stays f32 — the bf16 cast happens inside the kernel.
    x2d = x_nchw.reshape(n, 784)

    tile = _choose_tile(n)
    grid = (pl.cdiv(n, tile),)            # ragged last tile: rows independent,
                                          # garbage tail is dropped by OOB mask

    x_spec = pl.BlockSpec((tile, 784), lambda i: (i, 0))
    # Weights/biases: full-array blocks + constant index_map -> DMA'd once and
    # VMEM-resident across all grid steps.
    param_specs = [pl.BlockSpec(p.shape, lambda i: (0, 0)) for p in params]
    out_spec = pl.BlockSpec((tile, PAD_OUT), lambda i: (i, 0))

    out_padded = pl.pallas_call(
        _mlp_kernel,
        out_shape=jax.ShapeDtypeStruct((n, PAD_OUT), jnp.float32),
        grid=grid,
        in_specs=[x_spec] + param_specs,
        out_specs=out_spec,
        compiler_params=pltpu.CompilerParams(
            dimension_semantics=("parallel",),     # megacore sharding on v7x
            vmem_limit_bytes=32 * 1024 * 1024),    # clears v5e's 16 MiB default
    )(x2d, *params)

    return out_padded[:, :10]


def _reference(x_nchw, params):
    """Pure-JAX reference with the same bf16-weight / f32-accum math."""
    h = x_nchw.reshape(x_nchw.shape[0], 784).astype(jnp.bfloat16)
    ws = params[0::2]
    bs = params[1::2]
    for i in range(4):
        h = jnp.maximum(
            jnp.dot(h, ws[i], preferred_element_type=jnp.float32) + bs[i],
            0.0).astype(jnp.bfloat16)
    out = jnp.dot(h, ws[4], preferred_element_type=jnp.float32) + bs[4]
    return out[:, :10]


if __name__ == "__main__":
    key = jax.random.PRNGKey(0)
    key, kx = jax.random.split(key)

    # MNIST-like input: batch=8, NCHW [8, 1, 28, 28]
    x = jax.random.normal(kx, (8, 1, 28, 28), jnp.float32)
    params = init_params(key)

    out = net_forward(x, *params)
    out = jax.block_until_ready(out)

    ref = _reference(x, params)
    assert out.shape == (8, 10), out.shape
    assert jnp.allclose(out, ref, atol=2e-2, rtol=2e-2), "mismatch vs reference"

    print("KERNEL_OK")
</pallas_src>

<mosaic_0001>
module attributes {stable_mosaic.version = 11 : i64} {
  func.func @_mlp_kernel(%arg0: i32, %arg1: memref<8x784xf32, #tpu.memory_space<vmem>>, %arg2: memref<784x512xbf16, #tpu.memory_space<vmem>>, %arg3: memref<1x512xf32, #tpu.memory_space<vmem>>, %arg4: memref<512x256xbf16, #tpu.memory_space<vmem>>, %arg5: memref<1x256xf32, #tpu.memory_space<vmem>>, %arg6: memref<256x128xbf16, #tpu.memory_space<vmem>>, %arg7: memref<1x128xf32, #tpu.memory_space<vmem>>, %arg8: memref<128x128xbf16, #tpu.memory_space<vmem>>, %arg9: memref<1x128xf32, #tpu.memory_space<vmem>>, %arg10: memref<128x128xbf16, #tpu.memory_space<vmem>>, %arg11: memref<1x128xf32, #tpu.memory_space<vmem>>, %arg12: memref<8x128xf32, #tpu.memory_space<vmem>>) attributes {dimension_semantics = [#tpu.dimension_semantics<parallel>], iteration_bounds = array<i64: 1>, scalar_prefetch = 0 : i64, scratch_operands = 0 : i64, tpu.core_type = #tpu.core_type<tc>, window_params = [{transform_indices = @transform_0, window_bounds = array<i64: 8, 784>}, {pipeline_mode = #tpu.pipeline_mode<synchronous>, transform_indices = @transform_1, window_bounds = array<i64: 784, 512>}, {pipeline_mode = #tpu.pipeline_mode<synchronous>, transform_indices = @transform_2, window_bounds = array<i64: 1, 512>}, {pipeline_mode = #tpu.pipeline_mode<synchronous>, transform_indices = @transform_3, window_bounds = array<i64: 512, 256>}, {pipeline_mode = #tpu.pipeline_mode<synchronous>, transform_indices = @transform_4, window_bounds = array<i64: 1, 256>}, {pipeline_mode = #tpu.pipeline_mode<synchronous>, transform_indices = @transform_5, window_bounds = array<i64: 256, 128>}, {pipeline_mode = #tpu.pipeline_mode<synchronous>, transform_indices = @transform_6, window_bounds = array<i64: 1, 128>}, {pipeline_mode = #tpu.pipeline_mode<synchronous>, transform_indices = @transform_7, window_bounds = array<i64: 128, 128>}, {pipeline_mode = #tpu.pipeline_mode<synchronous>, transform_indices = @transform_8, window_bounds = array<i64: 1, 128>}, {pipeline_mode = #tpu.pipeline_mode<synchronous>, transform_indices = @transform_9, window_bounds = array<i64: 128, 128>}, {pipeline_mode = #tpu.pipeline_mode<synchronous>, transform_indices = @transform_10, window_bounds = array<i64: 1, 128>}, {transform_indices = @transform_11, window_bounds = array<i64: 8, 128>}]} {
    %c0 = arith.constant 0 : index
    %c0_0 = arith.constant 0 : index
    %0 = vector.load %arg1[%c0, %c0_0] : memref<8x784xf32, #tpu.memory_space<vmem>>, vector<8x784xf32>
    %1 = arith.truncf %0 : vector<8x784xf32> to vector<8x784xbf16>
    %c0_1 = arith.constant 0 : index
    %c0_2 = arith.constant 0 : index
    %2 = vector.load %arg2[%c0_1, %c0_2] : memref<784x512xbf16, #tpu.memory_space<vmem>>, vector<784x512xbf16>
    %cst = arith.constant dense<0.000000e+00> : vector<8x512xf32>
    %3 = tpu.matmul %1, %2, %cst {dimension_numbers = #tpu.dot_dimension_numbers<[1], [0], [0], [1], [0, 0, 1, 1], [], []>} : vector<8x784xbf16>, vector<784x512xbf16>, vector<8x512xf32> -> vector<8x512xf32>
    %c0_3 = arith.constant 0 : index
    %c0_4 = arith.constant 0 : index
    %4 = vector.load %arg3[%c0_3, %c0_4] : memref<1x512xf32, #tpu.memory_space<vmem>>, vector<1x512xf32>
    %5 = vector.broadcast %4 : vector<1x512xf32> to vector<8x512xf32>
    %6 = arith.addf %3, %5 : vector<8x512xf32>
    %cst_5 = arith.constant 0.000000e+00 : f32
    %7 = vector.broadcast %cst_5 : f32 to vector<8x512xf32>
    %8 = arith.maximumf %6, %7 : vector<8x512xf32>
    %9 = arith.truncf %8 : vector<8x512xf32> to vector<8x512xbf16>
    %c0_6 = arith.constant 0 : index
    %c0_7 = arith.constant 0 : index
    %10 = vector.load %arg4[%c0_6, %c0_7] : memref<512x256xbf16, #tpu.memory_space<vmem>>, vector<512x256xbf16>
    %cst_8 = arith.constant dense<0.000000e+00> : vector<8x256xf32>
    %11 = tpu.matmul %9, %10, %cst_8 {dimension_numbers = #tpu.dot_dimension_numbers<[1], [0], [0], [1], [0, 0, 1, 1], [], []>} : vector<8x512xbf16>, vector<512x256xbf16>, vector<8x256xf32> -> vector<8x256xf32>
    %c0_9 = arith.constant 0 : index
    %c0_10 = arith.constant 0 : index
    %12 = vector.load %arg5[%c0_9, %c0_10] : memref<1x256xf32, #tpu.memory_space<vmem>>, vector<1x256xf32>
    %13 = vector.broadcast %12 : vector<1x256xf32> to vector<8x256xf32>
    %14 = arith.addf %11, %13 : vector<8x256xf32>
    %cst_11 = arith.constant 0.000000e+00 : f32
    %15 = vector.broadcast %cst_11 : f32 to vector<8x256xf32>
    %16 = arith.maximumf %14, %15 : vector<8x256xf32>
    %17 = arith.truncf %16 : vector<8x256xf32> to vector<8x256xbf16>
    %c0_12 = arith.constant 0 : index
    %c0_13 = arith.constant 0 : index
    %18 = vector.load %arg6[%c0_12, %c0_13] : memref<256x128xbf16, #tpu.memory_space<vmem>>, vector<256x128xbf16>
    %cst_14 = arith.constant dense<0.000000e+00> : vector<8x128xf32>
    %19 = tpu.matmul %17, %18, %cst_14 {dimension_numbers = #tpu.dot_dimension_numbers<[1], [0], [0], [1], [0, 0, 1, 1], [], []>} : vector<8x256xbf16>, vector<256x128xbf16>, vector<8x128xf32> -> vector<8x128xf32>
    %c0_15 = arith.constant 0 : index
    %c0_16 = arith.constant 0 : index
    %20 = vector.load %arg7[%c0_15, %c0_16] : memref<1x128xf32, #tpu.memory_space<vmem>>, vector<1x128xf32>
    %21 = vector.broadcast %20 : vector<1x128xf32> to vector<8x128xf32>
    %22 = arith.addf %19, %21 : vector<8x128xf32>
    %cst_17 = arith.constant 0.000000e+00 : f32
    %23 = vector.broadcast %cst_17 : f32 to vector<8x128xf32>
    %24 = arith.maximumf %22, %23 : vector<8x128xf32>
    %25 = arith.truncf %24 : vector<8x128xf32> to vector<8x128xbf16>
    %c0_18 = arith.constant 0 : index
    %c0_19 = arith.constant 0 : index
    %26 = vector.load %arg8[%c0_18, %c0_19] : memref<128x128xbf16, #tpu.memory_space<vmem>>, vector<128x128xbf16>
    %cst_20 = arith.constant dense<0.000000e+00> : vector<8x128xf32>
    %27 = tpu.matmul %25, %26, %cst_20 {dimension_numbers = #tpu.dot_dimension_numbers<[1], [0], [0], [1], [0, 0, 1, 1], [], []>} : vector<8x128xbf16>, vector<128x128xbf16>, vector<8x128xf32> -> vector<8x128xf32>
    %c0_21 = arith.constant 0 : index
    %c0_22 = arith.constant 0 : index
    %28 = vector.load %arg9[%c0_21, %c0_22] : memref<1x128xf32, #tpu.memory_space<vmem>>, vector<1x128xf32>
    %29 = vector.broadcast %28 : vector<1x128xf32> to vector<8x128xf32>
    %30 = arith.addf %27, %29 : vector<8x128xf32>
    %cst_23 = arith.constant 0.000000e+00 : f32
    %31 = vector.broadcast %cst_23 : f32 to vector<8x128xf32>
    %32 = arith.maximumf %30, %31 : vector<8x128xf32>
    %33 = arith.truncf %32 : vector<8x128xf32> to vector<8x128xbf16>
    %c0_24 = arith.constant 0 : index
    %c0_25 = arith.constant 0 : index
    %34 = vector.load %arg10[%c0_24, %c0_25] : memref<128x128xbf16, #tpu.memory_space<vmem>>, vector<128x128xbf16>
    %cst_26 = arith.constant dense<0.000000e+00> : vector<8x128xf32>
    %35 = tpu.matmul %33, %34, %cst_26 {dimension_numbers = #tpu.dot_dimension_numbers<[1], [0], [0], [1], [0, 0, 1, 1], [], []>} : vector<8x128xbf16>, vector<128x128xbf16>, vector<8x128xf32> -> vector<8x128xf32>
    %c0_27 = arith.constant 0 : index
    %c0_28 = arith.constant 0 : index
    %36 = vector.load %arg11[%c0_27, %c0_28] : memref<1x128xf32, #tpu.memory_space<vmem>>, vector<1x128xf32>
    %37 = vector.broadcast %36 : vector<1x128xf32> to vector<8x128xf32>
    %38 = arith.addf %35, %37 : vector<8x128xf32>
    %c0_29 = arith.constant 0 : index
    %c0_30 = arith.constant 0 : index
    %39 = vector.load %arg12[%c0_29, %c0_30] : memref<8x128xf32, #tpu.memory_space<vmem>>, vector<8x128xf32>
    tpu.vector_store %arg12[%c0_29, %c0_30], %38 {strides = array<i32>} : memref<8x128xf32, #tpu.memory_space<vmem>>, vector<8x128xf32>,
    return
  }
  func.func @transform_0(%arg0: i32) -> (i32, i32) {
    %c0_i32 = arith.constant 0 : i32
    %c0_i32_0 = arith.constant 0 : i32
    return %arg0, %c0_i32 : i32, i32
  }
  func.func @transform_1(%arg0: i32) -> (i32, i32) {
    %c0_i32 = arith.constant 0 : i32
    %c0_i32_0 = arith.constant 0 : i32
    %c0_i32_1 = arith.constant 0 : i32
    return %c0_i32, %c0_i32_0 : i32, i32
  }
  func.func @transform_2(%arg0: i32) -> (i32, i32) {
    %c0_i32 = arith.constant 0 : i32
    %c0_i32_0 = arith.constant 0 : i32
    %c0_i32_1 = arith.constant 0 : i32
    return %c0_i32, %c0_i32_0 : i32, i32
  }
  func.func @transform_3(%arg0: i32) -> (i32, i32) {
    %c0_i32 = arith.constant 0 : i32
    %c0_i32_0 = arith.constant 0 : i32
    %c0_i32_1 = arith.constant 0 : i32
    return %c0_i32, %c0_i32_0 : i32, i32
  }
  func.func @transform_4(%arg0: i32) -> (i32, i32) {
    %c0_i32 = arith.constant 0 : i32
    %c0_i32_0 = arith.constant 0 : i32
    %c0_i32_1 = arith.constant 0 : i32
    return %c0_i32, %c0_i32_0 : i32, i32
  }
  func.func @transform_5(%arg0: i32) -> (i32, i32) {
    %c0_i32 = arith.constant 0 : i32
    %c0_i32_0 = arith.constant 0 : i32
    %c0_i32_1 = arith.constant 0 : i32
    return %c0_i32, %c0_i32_0 : i32, i32
  }
  func.func @transform_6(%arg0: i32) -> (i32, i32) {
    %c0_i32 = arith.constant 0 : i32
    %c0_i32_0 = arith.constant 0 : i32
    %c0_i32_1 = arith.constant 0 : i32
    return %c0_i32, %c0_i32_0 : i32, i32
  }
  func.func @transform_7(%arg0: i32) -> (i32, i32) {
    %c0_i32 = arith.constant 0 : i32
    %c0_i32_0 = arith.constant 0 : i32
    %c0_i32_1 = arith.constant 0 : i32
    return %c0_i32, %c0_i32_0 : i32, i32
  }
  func.func @transform_8(%arg0: i32) -> (i32, i32) {
    %c0_i32 = arith.constant 0 : i32
    %c0_i32_0 = arith.constant 0 : i32
    %c0_i32_1 = arith.constant 0 : i32
    return %c0_i32, %c0_i32_0 : i32, i32
  }
  func.func @transform_9(%arg0: i32) -> (i32, i32) {
    %c0_i32 = arith.constant 0 : i32
    %c0_i32_0 = arith.constant 0 : i32
    %c0_i32_1 = arith.constant 0 : i32
    return %c0_i32, %c0_i32_0 : i32, i32
  }
  func.func @transform_10(%arg0: i32) -> (i32, i32) {
    %c0_i32 = arith.constant 0 : i32
    %c0_i32_0 = arith.constant 0 : i32
    %c0_i32_1 = arith.constant 0 : i32
    return %c0_i32, %c0_i32_0 : i32, i32
  }
  func.func @transform_11(%arg0: i32) -> (i32, i32) {
    %c0_i32 = arith.constant 0 : i32
    %c0_i32_0 = arith.constant 0 : i32
    return %arg0, %c0_i32 : i32, i32
  }
}

</mosaic_0001>

<bundles_post_ra>
// kernel: net_forward.1
= control target key start
LH: loop header
LB: loop body
LE: loop exit
PB: predicated region body
PF: predicated region fallthrough
CT: control target
= control target key end

     0   :  { %16 = vsyncpa [#allocation3], 0  ;;  %s3858_s0 = inlined_call_operand.vmem [shape: f32[8,784], index: 0, kind: input, shape index: {}]   ;;  %s3859_s1 = inlined_call_operand.hbm [shape: bf16[784,512], index: 1, kind: input, shape index: {}]   ;;  %s3860_s2 = inlined_call_operand.vmem [shape: f32[1,512], index: 2, kind: input, shape index: {}]   ;;  %s3861_s3 = inlined_call_operand.vmem [shape: bf16[512,256], index: 3, kind: input, shape index: {}]   ;;  %s3862_s4 = inlined_call_operand.vmem [shape: f32[1,256], index: 4, kind: input, shape index: {}]   ;;  %s3863_s5 = inlined_call_operand.vmem [shape: bf16[256,128], index: 5, kind: input, shape index: {}]   ;;  %s3864_s6 = inlined_call_operand.vmem [shape: f32[1,128], index: 6, kind: input, shape index: {}]   ;;  %s3865_s7 = inlined_call_operand.vmem [shape: bf16[128,128], index: 7, kind: input, shape index: {}]   ;;  %s3866_s8 = inlined_call_operand.vmem [shape: f32[1,128], index: 8, kind: input, shape index: {}]   ;;  %s3867_s9 = inlined_call_operand.vmem [shape: bf16[128,128], index: 9, kind: input, shape index: {}]   ;;  %s3868_s10 = inlined_call_operand.vmem [shape: f32[1,128], index: 10, kind: input, shape index: {}]   ;;  %s3869_s11 = inlined_call_operand.hbm [shape: f32[8,128], index: 11, kind: output, shape index: {}]  }
   0x1   :  { %17 = vsyncpa [#allocation4], 0  ;;  %s3391_s17 = smov [#allocation2]   ;;  %s3343_s21 = scalar_lea.hbm %s3859_s1, 25088 }
   0x2   :  { %s25_s18 = sshll.u32 %s3391_s17, 4  ;;  %p3344_p0 = scmp.ne.s32.totalorder %s3859_s1, %s3343_s21  ;;  %s26_s18 = int_to_ptr.vmem [resolvable:$true] %s25_s18 }
   0x3   :  { %p3347_p1 = scmp.lt.u32.totalorder %s3343_s21, %s3859_s1 }
   0x5   :  { %p3349_p2 = pnand %p3347_p1, %p3344_p0 }
   0x7   :  { %3352 = shalt.err (!%p3349_p2)
}
   0x8   :  { %s3353_s26 = scalar_lea.vmem %s26_s18, 25088  ;;  %p3358_p4 = scmp.lt.s32.totalorder %s26_s18, %s26_s18 }
   0x9   :  { %p3354_p3 = scmp.ne.s32.totalorder %s26_s18, %s3353_s26  ;;  %p3359_p5 = scmp.lt.s32.totalorder %s3353_s26, %s3353_s26 }
   0xb   :  { %p3360_p6 = por %p3359_p5, %p3358_p4 }
   0xd   :  { %p3361_p7 = pnand %p3360_p6, %p3354_p3 }
   0xf   :  { %3364 = shalt.err (!%p3361_p7)
}
  0x10   :  { %s3392_s27 = smov 256   ;;  %s3393_s28 = smov 16  }
  0x11   :  { %31 = dma.hbm_to_vmem [thread:$0]  %s3859_s1, 25088, %s26_s18, [#allocation3], %s3392_s27, %s3392_s27, %s3393_s28  }
  0x12   :  { %3387 = dma.done.wait [#allocation3], 25088  }
  0x13   :  { %3388 = vsyncadd [#allocation3], 4294942208  ;;  %v3394_v0 = vmov 0   ;;  %v2921_v1 = vld [vmem:[#allocation2 + $0x4] ss:$16 sps:$4 sm:$0xff]   ;;  %vm1266_vm0 = vcmask 130048  }
  0x14   :  { %1425 = vmatprep.mubr.bf16.mxu1 %v3394_v0  ;;  %v2923_v2 = vld [vmem:[#allocation2 + $0x604] ss:$16 sps:$4 sm:$0xff]   ;;  %1270 = vmatprep.subr.bf16.mxu0 %v2921_v1  ;;  %v2925_v3 = vld [vmem:[#allocation2] ss:$16 sps:$4 sm:$0xff]   ;;  %v2929_v6 = vld [vmem:[#allocation2 + $0x8] ss:$16 sps:$4 sm:$0xff]  }
  0x15   :  { %v2926_v4 = vld [vmem:[#allocation2 + $0x600] ss:$16 sps:$4 sm:$0xff]   ;;  %1393 = vmatprep.subr.bf16.mxu1 %v2923_v2  ;;  %v2927_v5 = vld [vmem:[#allocation2 + $0x24] ss:$16 sps:$4 sm:$0xff]   ;;  %1271 = vmatpush1.bf16.msra.mxu0 %v2925_v3  ;;  %v2931_v7 = vld [vmem:[#allocation2 + $0xc] ss:$16 sps:$4 sm:$0xff]  }
  0x16   :  { %1394 = vmatpush1.bf16.msra.mxu1 %v2926_v4  ;;  %1272 = vmatprep.subr.bf16.mxu0 %v2927_v5  ;;  %v2932_v8 = vld [vmem:[#allocation2 + $0x20] ss:$16 sps:$4 sm:$0xff]   ;;  %v2933_v11 = vld [vmem:[#allocation2 + $0x44] ss:$16 sps:$4 sm:$0xff]   ;;  %v2935_v12 = vld [vmem:[#allocation2 + $0x28] ss:$16 sps:$4 sm:$0xff]  }
  0x17   :  { %v60_v9 = vld [vmem:[%s3858_s0 + $0x30] sm:$0xff]  ;;  %1434 = vmatprep.subr.bf16.mxu1 %v2931_v7  ;;  %v2937_v13 = vld [vmem:[#allocation2 + $0x2c] ss:$16 sps:$4 sm:$0xff]   ;;  %v2941_v18 = vld [vmem:[#allocation2 + $0x48] ss:$16 sps:$4 sm:$0xff]   ;;  %vm3396_vm1 = vmmov 0  }
  0x18   :  { %v3474_v10 = vpack.c.bf16 %v60_v9, %v60_v9  ;;  %v2938_v14 = vld [vmem:[#allocation2 + $0x40] ss:$16 sps:$4 sm:$0xff]   ;;  %v2939_v15 = vld [vmem:[#allocation2 + $0x64] ss:$16 sps:$4 sm:$0xff]   ;;  %v2943_v16 = vld [vmem:[#allocation2 + $0x4c] ss:$16 sps:$4 sm:$0xff]  }
  0x19   :  { %1273 = vmatpush1.bf16.msra.mxu0 %v2932_v8  ;;  %v2944_v17 = vld [vmem:[#allocation2 + $0x60] ss:$16 sps:$4 sm:$0xff]   ;;  %v2945_v19 = vld [vmem:[#allocation2 + $0x84] ss:$16 sps:$4 sm:$0xff]   ;;  %v2949_v20 = vld [vmem:[#allocation2 + $0x6c] ss:$16 sps:$4 sm:$0xff]  }
  0x1a   :  { %2701 = vmatmul.mubr.msk.bf16.vlgmr.msra.gmra.mrb[0].mxu1 %vm1266_vm0, %v3474_v10  ;;  %1274 = vmatprep.subr.bf16.mxu0 %v2933_v11  ;;  %v2947_v21 = vld [vmem:[#allocation2 + $0x68] ss:$16 sps:$4 sm:$0xff]   ;;  %v2950_v22 = vld [vmem:[#allocation2 + $0x80] ss:$16 sps:$4 sm:$0xff]   ;;  %v2951_v23 = vld [vmem:[#allocation2 + $0xa4] ss:$16 sps:$4 sm:$0xff]  }
  0x1b   :  { %1435 = vmatpush1.bf16.msra.mxu1 %v2929_v6  ;;  %v2955_v24 = vld [vmem:[#allocation2 + $0x8c] ss:$16 sps:$4 sm:$0xff]   ;;  %v2956_v25 = vld [vmem:[#allocation2 + $0xa0] ss:$16 sps:$4 sm:$0xff]   ;;  %v2953_v26 = vld [vmem:[#allocation2 + $0x88] ss:$16 sps:$4 sm:$0xff]  }
  0x1c   :  { %1436 = vmatprep.subr.bf16.mxu1 %v2937_v13  ;;  %v2957_v27 = vld [vmem:[#allocation2 + $0xc4] ss:$16 sps:$4 sm:$0xff]   ;;  %v2961_v28 = vld [vmem:[#allocation2 + $0xac] ss:$16 sps:$4 sm:$0xff]   ;;  %v2959_v29 = vld [vmem:[#allocation2 + $0xa8] ss:$16 sps:$4 sm:$0xff]  }
  0x1d   :  { %1275 = vmatpush1.bf16.msra.mxu0 %v2938_v14  ;;  %v2962_v30 = vld [vmem:[#allocation2 + $0xc0] ss:$16 sps:$4 sm:$0xff]   ;;  %v2963_v31 = vld [vmem:[#allocation2 + $0xe4] ss:$16 sps:$4 sm:$0xff]   ;;  %v2967_v32 = vld [vmem:[#allocation2 + $0xcc] ss:$16 sps:$4 sm:$0xff]  }
  0x1e   :  { %1276 = vmatprep.subr.bf16.mxu0 %v2939_v15  ;;  %v2968_v33 = vld [vmem:[#allocation2 + $0xe0] ss:$16 sps:$4 sm:$0xff]   ;;  %v2965_v34 = vld [vmem:[#allocation2 + $0xc8] ss:$16 sps:$4 sm:$0xff]   ;;  %v2969_v35 = vld [vmem:[#allocation2 + $0x104] ss:$16 sps:$4 sm:$0xff]  }
  0x1f   :  { %1437 = vmatpush1.bf16.msra.mxu1 %v2935_v12  ;;  %v2973_v36 = vld [vmem:[#allocation2 + $0xec] ss:$16 sps:$4 sm:$0xff]   ;;  %v2971_v37 = vld [vmem:[#allocation2 + $0xe8] ss:$16 sps:$4 sm:$0xff]   ;;  %v2974_v38 = vld [vmem:[#allocation2 + $0x100] ss:$16 sps:$4 sm:$0xff]  }
  0x20   :  { %1438 = vmatprep.subr.bf16.mxu1 %v2943_v16  ;;  %v2975_v39 = vld [vmem:[#allocation2 + $0x124] ss:$16 sps:$4 sm:$0xff]   ;;  %v2979_v40 = vld [vmem:[#allocation2 + $0x10c] ss:$16 sps:$4 sm:$0xff]   ;;  %v2980_v41 = vld [vmem:[#allocation2 + $0x120] ss:$16 sps:$4 sm:$0xff]  }
  0x21   :  { %1277 = vmatpush1.bf16.msra.mxu0 %v2944_v17  ;;  %v2977_v42 = vld [vmem:[#allocation2 + $0x108] ss:$16 sps:$4 sm:$0xff]   ;;  %v2981_v43 = vld [vmem:[#allocation2 + $0x144] ss:$16 sps:$4 sm:$0xff]   ;;  %v2985_v44 = vld [vmem:[#allocation2 + $0x12c] ss:$16 sps:$4 sm:$0xff]  }
  0x22   :  { %1278 = vmatprep.subr.bf16.mxu0 %v2945_v19  ;;  %v2983_v45 = vld [vmem:[#allocation2 + $0x128] ss:$16 sps:$4 sm:$0xff]   ;;  %v2986_v46 = vld [vmem:[#allocation2 + $0x140] ss:$16 sps:$4 sm:$0xff]   ;;  %v2987_v47 = vld [vmem:[#allocation2 + $0x164] ss:$16 sps:$4 sm:$0xff]  }
  0x23   :  { %1439 = vmatpush1.bf16.msra.mxu1 %v2941_v18  ;;  %v2991_v48 = vld [vmem:[#allocation2 + $0x14c] ss:$16 sps:$4 sm:$0xff]   ;;  %v2992_v50 = vld [vmem:[#allocation2 + $0x160] ss:$16 sps:$4 sm:$0xff]   ;;  %v2989_v52 = vld [vmem:[#allocation2 + $0x148] ss:$16 sps:$4 sm:$0xff]  }
  0x24   :  { %1440 = vmatprep.subr.bf16.mxu1 %v2949_v20  ;;  %v55_v49 = vld [vmem:[%s3858_s0 + $0x8] sm:$0xff]  ;;  %v2993_v53 = vld [vmem:[#allocation2 + $0x184] ss:$16 sps:$4 sm:$0xff]   ;;  %v2998_v56 = vld [vmem:[#allocation2 + $0x180] ss:$16 sps:$4 sm:$0xff]   ;;  %s3397_s25 = smov [#allocation5]  }
  0x25   :  { %1279 = vmatpush1.bf16.msra.mxu0 %v2950_v22  ;;  %v62_v51 = vpack.c.bf16 %v55_v49, %v55_v49  ;;  %v2997_v54 = vld [vmem:[#allocation2 + $0x16c] ss:$16 sps:$4 sm:$0xff]   ;;  %v2995_v55 = vld [vmem:[#allocation2 + $0x168] ss:$16 sps:$4 sm:$0xff]   ;;  %v2999_v57 = vld [vmem:[#allocation2 + $0x1a4] ss:$16 sps:$4 sm:$0xff]  }
  0x26   :  { %1280 = vmatprep.subr.bf16.mxu0 %v2951_v23  ;;  %v3003_v58 = vld [vmem:[#allocation2 + $0x18c] ss:$16 sps:$4 sm:$0xff]   ;;  %v3001_v59 = vld [vmem:[#allocation2 + $0x188] ss:$16 sps:$4 sm:$0xff]   ;;  %v3004_v60 = vld [vmem:[#allocation2 + $0x1a0] ss:$16 sps:$4 sm:$0xff]  }
  0x27   :  { %1441 = vmatpush1.bf16.msra.mxu1 %v2947_v21  ;;  %1302 = vmatprep.mubr.bf16.mxu0 %v62_v51  ;;  %v3005_v61 = vld [vmem:[#allocation2 + $0x1c4] ss:$16 sps:$4 sm:$0xff]   ;;  %v3009_v62 = vld [vmem:[#allocation2 + $0x1ac] ss:$16 sps:$4 sm:$0xff]   ;;  %v3007_v63 = vld [vmem:[#allocation2 + $0x1a8] ss:$16 sps:$4 sm:$0xff]  }
  0x28   :  { %1442 = vmatprep.subr.bf16.mxu1 %v2955_v24  ;;  %1466 = vmatprep.mubr.bf16.mxu1 %v62_v51  ;;  %v3010_v1 = vld [vmem:[#allocation2 + $0x1c0] ss:$16 sps:$4 sm:$0xff]   ;;  %v3011_v2 = vld [vmem:[#allocation2 + $0x1e4] ss:$16 sps:$4 sm:$0xff]   ;;  %v3015_v3 = vld [vmem:[#allocation2 + $0x1cc] ss:$16 sps:$4 sm:$0xff]  }
  0x29   :  { %1281 = vmatpush1.bf16.msra.mxu0 %v2956_v25  ;;  %v3013_v4 = vld [vmem:[#allocation2 + $0x1c8] ss:$16 sps:$4 sm:$0xff]   ;;  %v3016_v5 = vld [vmem:[#allocation2 + $0x1e0] ss:$16 sps:$4 sm:$0xff]   ;;  %v3019_v7 = vld [vmem:[#allocation2 + $0x204] ss:$16 sps:$4 sm:$0xff]  }
  0x2a   :  { %1282 = vmatprep.subr.bf16.mxu0 %v2957_v27  ;;  %v54_v6 = vld [vmem:[%s3858_s0] sm:$0xff]  ;;  %v3022_v8 = vld [vmem:[#allocation2 + $0x1ec] ss:$16 sps:$4 sm:$0xff]   ;;  %v3020_v12 = vld [vmem:[#allocation2 + $0x1e8] ss:$16 sps:$4 sm:$0xff]   ;;  %s2496_s26 = sshll.u32 %s3397_s25, 4  ;;  %s2497_s26 = int_to_ptr.vmem [resolvable:$true] %s2496_s26 }
  0x2b   :  { %1443 = vmatpush1.bf16.msra.mxu1 %v2953_v26  ;;  %v61_v9 = vpack.c.bf16 %v54_v6, %v54_v6  ;;  %v3017_v11 = vld [vmem:[#allocation2 + $0x200] ss:$16 sps:$4 sm:$0xff]   ;;  %v3025_v13 = vld [vmem:[#allocation2 + $0x224] ss:$16 sps:$4 sm:$0xff]   ;;  %v3028_v14 = vld [vmem:[#allocation2 + $0x20c] ss:$16 sps:$4 sm:$0xff]   ;;  %p3370_p9 = scmp.lt.s32.totalorder %s2497_s26, %s2497_s26 }
  0x2c   :  { %1444 = vmatprep.subr.bf16.mxu1 %v2961_v28  ;;  %v3023_v15 = vld [vmem:[#allocation2 + $0x220] ss:$16 sps:$4 sm:$0xff]   ;;  %v3026_v16 = vld [vmem:[#allocation2 + $0x208] ss:$16 sps:$4 sm:$0xff]   ;;  %v3031_v17 = vld [vmem:[#allocation2 + $0x244] ss:$16 sps:$4 sm:$0xff]  }
  0x2d   :  { %1283 = vmatpush1.bf16.msra.mxu0 %v2962_v30  ;;  %v3034_v18 = vld [vmem:[#allocation2 + $0x22c] ss:$16 sps:$4 sm:$0xff]   ;;  %v3029_v19 = vld [vmem:[#allocation2 + $0x240] ss:$16 sps:$4 sm:$0xff]   ;;  %v3032_v20 = vld [vmem:[#allocation2 + $0x228] ss:$16 sps:$4 sm:$0xff]  }
  0x2e   :  { %1284 = vmatprep.subr.bf16.mxu0 %v2963_v31  ;;  %v3037_v21 = vld [vmem:[#allocation2 + $0x264] ss:$16 sps:$4 sm:$0xff]   ;;  %v3040_v22 = vld [vmem:[#allocation2 + $0x24c] ss:$16 sps:$4 sm:$0xff]   ;;  %v3035_v23 = vld [vmem:[#allocation2 + $0x260] ss:$16 sps:$4 sm:$0xff]  }
  0x2f   :  { %1445 = vmatpush1.bf16.msra.mxu1 %v2959_v29  ;;  %v3038_v24 = vld [vmem:[#allocation2 + $0x248] ss:$16 sps:$4 sm:$0xff]   ;;  %v3043_v25 = vld [vmem:[#allocation2 + $0x284] ss:$16 sps:$4 sm:$0xff]   ;;  %v3046_v26 = vld [vmem:[#allocation2 + $0x26c] ss:$16 sps:$4 sm:$0xff]  }
  0x30   :  { %1446 = vmatprep.subr.bf16.mxu1 %v2967_v32  ;;  %v3041_v27 = vld [vmem:[#allocation2 + $0x280] ss:$16 sps:$4 sm:$0xff]   ;;  %v3044_v28 = vld [vmem:[#allocation2 + $0x268] ss:$16 sps:$4 sm:$0xff]   ;;  %v3049_v29 = vld [vmem:[#allocation2 + $0x2a4] ss:$16 sps:$4 sm:$0xff]  }
  0x31   :  { %1285 = vmatpush1.bf16.msra.mxu0 %v2968_v33  ;;  %v3052_v30 = vld [vmem:[#allocation2 + $0x28c] ss:$16 sps:$4 sm:$0xff]   ;;  %v3047_v31 = vld [vmem:[#allocation2 + $0x2a0] ss:$16 sps:$4 sm:$0xff]   ;;  %v3050_v32 = vld [vmem:[#allocation2 + $0x288] ss:$16 sps:$4 sm:$0xff]  }
  0x32   :  { %1286 = vmatprep.subr.bf16.mxu0 %v2969_v35  ;;  %v3055_v33 = vld [vmem:[#allocation2 + $0x2c4] ss:$16 sps:$4 sm:$0xff]   ;;  %v57_v35 = vld [vmem:[%s3858_s0 + $0x18] sm:$0xff]  ;;  %v3071_v49 = vld [vmem:[#allocation2 + $0x320] ss:$16 sps:$4 sm:$0xff]  }
  0x33   :  { %1447 = vmatpush1.bf16.msra.mxu1 %v2965_v34  ;;  %v3058_v34 = vld [vmem:[#allocation2 + $0x2ac] ss:$16 sps:$4 sm:$0xff]   ;;  %v3079_v51 = vld [vmem:[#allocation2 + $0x344] ss:$16 sps:$4 sm:$0xff]   ;;  %v3101_v6 = vld [vmem:[#allocation2 + $0x3c0] ss:$16 sps:$4 sm:$0xff]  }
  0x34   :  { %1448 = vmatprep.subr.bf16.mxu1 %v2973_v36  ;;  %v64_v36 = vpack.c.bf16 %v57_v35, %v57_v35  ;;  %v3137_v35 = vld [vmem:[#allocation2 + $0x480] ss:$16 sps:$4 sm:$0xff]  }
  0x35   :  { %1287 = vmatpush1.bf16.msra.mxu0 %v2974_v38  ;;  %v3056_v38 = vld [vmem:[#allocation2 + $0x2a8] ss:$16 sps:$4 sm:$0xff]  }
  0x36   :  { %1288 = vmatprep.subr.bf16.mxu0 %v2975_v39  ;;  %v3061_v39 = vld [vmem:[#allocation2 + $0x2e4] ss:$16 sps:$4 sm:$0xff]  }
  0x37   :  { %1449 = vmatpush1.bf16.msra.mxu1 %v2971_v37  ;;  %v3053_v37 = vld [vmem:[#allocation2 + $0x2c0] ss:$16 sps:$4 sm:$0xff]  }
  0x38   :  { %1450 = vmatprep.subr.bf16.mxu1 %v2979_v40  ;;  %v3064_v40 = vld [vmem:[#allocation2 + $0x2cc] ss:$16 sps:$4 sm:$0xff]  }
  0x39   :  { %1289 = vmatpush1.bf16.msra.mxu0 %v2980_v41  ;;  %v3059_v41 = vld [vmem:[#allocation2 + $0x2e0] ss:$16 sps:$4 sm:$0xff]  }
  0x3a   :  { %1290 = vmatprep.subr.bf16.mxu0 %v2981_v43  ;;  %v3067_v43 = vld [vmem:[#allocation2 + $0x304] ss:$16 sps:$4 sm:$0xff]  }
  0x3b   :  { %1451 = vmatpush1.bf16.msra.mxu1 %v2977_v42  ;;  %v3062_v42 = vld [vmem:[#allocation2 + $0x2c8] ss:$16 sps:$4 sm:$0xff]  }
  0x3c   :  { %1452 = vmatprep.subr.bf16.mxu1 %v2985_v44  ;;  %v3070_v44 = vld [vmem:[#allocation2 + $0x2ec] ss:$16 sps:$4 sm:$0xff]  }
  0x3d   :  { %1291 = vmatpush1.bf16.msra.mxu0 %v2986_v46  ;;  %v3068_v46 = vld [vmem:[#allocation2 + $0x2e8] ss:$16 sps:$4 sm:$0xff]  }
  0x3e   :  { %1292 = vmatprep.subr.bf16.mxu0 %v2987_v47  ;;  %v3073_v47 = vld [vmem:[#allocation2 + $0x324] ss:$16 sps:$4 sm:$0xff]  }
  0x3f   :  { %1453 = vmatpush1.bf16.msra.mxu1 %v2983_v45  ;;  %v3065_v45 = vld [vmem:[#allocation2 + $0x300] ss:$16 sps:$4 sm:$0xff]  }
  0x40   :  { %1454 = vmatprep.subr.bf16.mxu1 %v2991_v48  ;;  %v3076_v48 = vld [vmem:[#allocation2 + $0x30c] ss:$16 sps:$4 sm:$0xff]  }
  0x41   :  { %1293 = vmatpush1.bf16.msra.mxu0 %v2992_v50  ;;  %v3074_v50 = vld [vmem:[#allocation2 + $0x308] ss:$16 sps:$4 sm:$0xff]  }
  0x42   :  { %1294 = vmatprep.subr.bf16.mxu0 %v2993_v53  ;;  %v3077_v53 = vld [vmem:[#allocation2 + $0x340] ss:$16 sps:$4 sm:$0xff]  }
  0x43   :  { %1455 = vmatpush1.bf16.msra.mxu1 %v2989_v52  ;;  %v3082_v52 = vld [vmem:[#allocation2 + $0x32c] ss:$16 sps:$4 sm:$0xff]  }
  0x44   :  { %1456 = vmatprep.subr.bf16.mxu1 %v2997_v54  ;;  %v3080_v54 = vld [vmem:[#allocation2 + $0x328] ss:$16 sps:$4 sm:$0xff]  }
  0x45   :  { %1295 = vmatpush1.bf16.msra.mxu0 %v2998_v56  ;;  %v3088_v56 = vld [vmem:[#allocation2 + $0x34c] ss:$16 sps:$4 sm:$0xff]  }
  0x46   :  { %1296 = vmatprep.subr.bf16.mxu0 %v2999_v57  ;;  %v3083_v57 = vld [vmem:[#allocation2 + $0x360] ss:$16 sps:$4 sm:$0xff]  }
  0x47   :  { %1457 = vmatpush1.bf16.msra.mxu1 %v2995_v55  ;;  %v3085_v55 = vld [vmem:[#allocation2 + $0x364] ss:$16 sps:$4 sm:$0xff]  }
  0x48   :  { %1458 = vmatprep.subr.bf16.mxu1 %v3003_v58  ;;  %v3086_v58 = vld [vmem:[#allocation2 + $0x348] ss:$16 sps:$4 sm:$0xff]  }
  0x49   :  { %1297 = vmatpush1.bf16.msra.mxu0 %v3004_v60  ;;  %v3094_v60 = vld [vmem:[#allocation2 + $0x36c] ss:$16 sps:$4 sm:$0xff]  }
  0x4a   :  { %1298 = vmatprep.subr.bf16.mxu0 %v3005_v61  ;;  %v3089_v61 = vld [vmem:[#allocation2 + $0x380] ss:$16 sps:$4 sm:$0xff]  }
  0x4b   :  { %1459 = vmatpush1.bf16.msra.mxu1 %v3001_v59  ;;  %v3091_v59 = vld [vmem:[#allocation2 + $0x384] ss:$16 sps:$4 sm:$0xff]  }
  0x4c   :  { %1460 = vmatprep.subr.bf16.mxu1 %v3009_v62  ;;  %v3092_v62 = vld [vmem:[#allocation2 + $0x368] ss:$16 sps:$4 sm:$0xff]  }
  0x4d   :  { %1299 = vmatpush1.bf16.msra.mxu0 %v3010_v1  ;;  %v3100_v1 = vld [vmem:[#allocation2 + $0x38c] ss:$16 sps:$4 sm:$0xff]  }
  0x4e   :  { %1300 = vmatprep.subr.bf16.mxu0 %v3011_v2  ;;  %v3095_v2 = vld [vmem:[#allocation2 + $0x3a0] ss:$16 sps:$4 sm:$0xff]  }
  0x4f   :  { %1461 = vmatpush1.bf16.msra.mxu1 %v3007_v63  ;;  %v3097_v63 = vld [vmem:[#allocation2 + $0x3a4] ss:$16 sps:$4 sm:$0xff]  }
  0x50   :  { %1462 = vmatprep.subr.bf16.mxu1 %v3015_v3  ;;  %v3098_v3 = vld [vmem:[#allocation2 + $0x388] ss:$16 sps:$4 sm:$0xff]  }
  0x51   :  { %1301 = vmatpush1.bf16.msra.mxu0 %v3016_v5  ;;  %v3106_v5 = vld [vmem:[#allocation2 + $0x3ac] ss:$16 sps:$4 sm:$0xff]  }
  0x52   :  { %1311 = vmatprep.subr.bf16.mxu0 %v3019_v7  ;;  %v3104_v7 = vld [vmem:[#allocation2 + $0x3a8] ss:$16 sps:$4 sm:$0xff]  }
  0x53   :  { %1463 = vmatpush1.bf16.msra.mxu1 %v3013_v4  ;;  %v3103_v4 = vld [vmem:[#allocation2 + $0x3c4] ss:$16 sps:$4 sm:$0xff]  }
  0x54   :  { %1464 = vmatprep.subr.bf16.mxu1 %v3022_v8  ;;  %1303 = vmatmul.mubr.bf16.vlgmr.msra.gmra.mrb[0].mxu0 %v61_v9  ;;  %v3109_v8 = vld [vmem:[#allocation2 + $0x3e4] ss:$16 sps:$4 sm:$0xff]  }
  0x55   :  { %1312 = vmatpush1.bf16.msra.mxu0 %v3017_v11  ;;  %1343 = vmatprep.mubr.bf16.mxu0 %v64_v36  ;;  %v3107_v11 = vld [vmem:[#allocation2 + $0x3e0] ss:$16 sps:$4 sm:$0xff]  }
  0x56   :  { %1313 = vmatprep.subr.bf16.mxu0 %v3025_v13  ;;  %v3110_v13 = vld [vmem:[#allocation2 + $0x3c8] ss:$16 sps:$4 sm:$0xff]  }
  0x57   :  { %1465 = vmatpush1.bf16.msra.mxu1 %v3020_v12  ;;  %v56_v12 = vld [vmem:[%s3858_s0 + $0x10] sm:$0xff] }
  0x58   :  { %1475 = vmatprep.subr.bf16.mxu1 %v3028_v14  ;;  %v3115_v14 = vld [vmem:[#allocation2 + $0x404] ss:$16 sps:$4 sm:$0xff]  }
  0x59   :  { %1314 = vmatpush1.bf16.msra.mxu0 %v3023_v15  ;;  %v3118_v15 = vld [vmem:[#allocation2 + $0x3ec] ss:$16 sps:$4 sm:$0xff]  }
  0x5a   :  { %1467 = vmatmul.mubr.bf16.vlgmr.msra.gmra.mrb[4].mxu1 %v61_v9  ;;  %1315 = vmatprep.subr.bf16.mxu0 %v3031_v17  ;;  %v3112_v9 = vld [vmem:[#allocation2 + $0x3cc] ss:$16 sps:$4 sm:$0xff]   ;;  %v3113_v17 = vld [vmem:[#allocation2 + $0x400] ss:$16 sps:$4 sm:$0xff]  }
  0x5b   :  { %1476 = vmatpush1.bf16.msra.mxu1 %v3026_v16  ;;  %1507 = vmatprep.mubr.bf16.mxu1 %v64_v36  ;;  %v63_v16 = vpack.c.bf16 %v56_v12, %v56_v12  ;;  %v3140_v36 = vld [vmem:[#allocation2 + $0x468] ss:$16 sps:$4 sm:$0xff]   ;;  %v3202_v12 = vld [vmem:[#allocation2 + $0x5ac] ss:$16 sps:$4 sm:$0xff]  }
  0x5c   :  { %1477 = vmatprep.subr.bf16.mxu1 %v3034_v18  ;;  %v3116_v18 = vld [vmem:[#allocation2 + $0x3e8] ss:$16 sps:$4 sm:$0xff]  }
  0x5d   :  { %1316 = vmatpush1.bf16.msra.mxu0 %v3029_v19  ;;  %v3121_v19 = vld [vmem:[#allocation2 + $0x424] ss:$16 sps:$4 sm:$0xff]  }
  0x5e   :  { %1317 = vmatprep.subr.bf16.mxu0 %v3037_v21  ;;  %v3124_v21 = vld [vmem:[#allocation2 + $0x40c] ss:$16 sps:$4 sm:$0xff]  }
  0x5f   :  { %1478 = vmatpush1.bf16.msra.mxu1 %v3032_v20  ;;  %v59_v20 = vld [vmem:[%s3858_s0 + $0x28] sm:$0xff] }
  0x60   :  { %1479 = vmatprep.subr.bf16.mxu1 %v3040_v22  ;;  %v66_v22 = vpack.c.bf16 %v59_v20, %v59_v20  ;;  %v3217_v20 = vld [vmem:[%s3861_s3 + $0x4] ss:$8 sps:$4 sm:$0xff]  }
  0x61   :  { %1318 = vmatpush1.bf16.msra.mxu0 %v3035_v23  ;;  %v3119_v23 = vld [vmem:[#allocation2 + $0x420] ss:$16 sps:$4 sm:$0xff]  }
  0x62   :  { %1319 = vmatprep.subr.bf16.mxu0 %v3043_v25  ;;  %v3127_v25 = vld [vmem:[#allocation2 + $0x444] ss:$16 sps:$4 sm:$0xff]  }
  0x63   :  { %1480 = vmatpush1.bf16.msra.mxu1 %v3038_v24  ;;  %v3122_v24 = vld [vmem:[#allocation2 + $0x408] ss:$16 sps:$4 sm:$0xff]  }
  0x64   :  { %1481 = vmatprep.subr.bf16.mxu1 %v3046_v26  ;;  %v3130_v26 = vld [vmem:[#allocation2 + $0x42c] ss:$16 sps:$4 sm:$0xff]  }
  0x65   :  { %1320 = vmatpush1.bf16.msra.mxu0 %v3041_v27  ;;  %v3125_v27 = vld [vmem:[#allocation2 + $0x440] ss:$16 sps:$4 sm:$0xff]  }
  0x66   :  { %1321 = vmatprep.subr.bf16.mxu0 %v3049_v29  ;;  %v3133_v29 = vld [vmem:[#allocation2 + $0x464] ss:$16 sps:$4 sm:$0xff]  }
  0x67   :  { %1482 = vmatpush1.bf16.msra.mxu1 %v3044_v28  ;;  %v3128_v28 = vld [vmem:[#allocation2 + $0x428] ss:$16 sps:$4 sm:$0xff]  }
  0x68   :  { %1483 = vmatprep.subr.bf16.mxu1 %v3052_v30  ;;  %v3136_v30 = vld [vmem:[#allocation2 + $0x44c] ss:$16 sps:$4 sm:$0xff]  }
  0x69   :  { %1322 = vmatpush1.bf16.msra.mxu0 %v3047_v31  ;;  %v3131_v31 = vld [vmem:[#allocation2 + $0x460] ss:$16 sps:$4 sm:$0xff]  }
  0x6a   :  { %1323 = vmatprep.subr.bf16.mxu0 %v3055_v33  ;;  %v3139_v33 = vld [vmem:[#allocation2 + $0x484] ss:$16 sps:$4 sm:$0xff]  }
  0x6b   :  { %1484 = vmatpush1.bf16.msra.mxu1 %v3050_v32  ;;  %v3134_v32 = vld [vmem:[#allocation2 + $0x448] ss:$16 sps:$4 sm:$0xff]  }
  0x6c   :  { %1485 = vmatprep.subr.bf16.mxu1 %v3058_v34  ;;  %v3142_v34 = vld [vmem:[#allocation2 + $0x46c] ss:$16 sps:$4 sm:$0xff]  }
  0x6d   :  { %1324 = vmatpush1.bf16.msra.mxu0 %v3053_v37  ;;  %v3145_v37 = vld [vmem:[#allocation2 + $0x4a4] ss:$16 sps:$4 sm:$0xff]  }
  0x6e   :  { %1325 = vmatprep.subr.bf16.mxu0 %v3061_v39  ;;  %v3143_v39 = vld [vmem:[#allocation2 + $0x4a0] ss:$16 sps:$4 sm:$0xff]  }
  0x6f   :  { %1486 = vmatpush1.bf16.msra.mxu1 %v3056_v38  ;;  %v3148_v38 = vld [vmem:[#allocation2 + $0x48c] ss:$16 sps:$4 sm:$0xff]  }
  0x70   :  { %1487 = vmatprep.subr.bf16.mxu1 %v3064_v40  ;;  %v3146_v40 = vld [vmem:[#allocation2 + $0x488] ss:$16 sps:$4 sm:$0xff]  }
  0x71   :  { %1326 = vmatpush1.bf16.msra.mxu0 %v3059_v41  ;;  %v3151_v41 = vld [vmem:[#allocation2 + $0x4c4] ss:$16 sps:$4 sm:$0xff]  }
  0x72   :  { %1327 = vmatprep.subr.bf16.mxu0 %v3067_v43  ;;  %v3149_v43 = vld [vmem:[#allocation2 + $0x4c0] ss:$16 sps:$4 sm:$0xff]  }
  0x73   :  { %1488 = vmatpush1.bf16.msra.mxu1 %v3062_v42  ;;  %v3154_v42 = vld [vmem:[#allocation2 + $0x4ac] ss:$16 sps:$4 sm:$0xff]  }
  0x74   :  { %1489 = vmatprep.subr.bf16.mxu1 %v3070_v44  ;;  %v3152_v44 = vld [vmem:[#allocation2 + $0x4a8] ss:$16 sps:$4 sm:$0xff]  }
  0x75   :  { %1328 = vmatpush1.bf16.msra.mxu0 %v3065_v45  ;;  %v3157_v45 = vld [vmem:[#allocation2 + $0x4e4] ss:$16 sps:$4 sm:$0xff]  }
  0x76   :  { %1329 = vmatprep.subr.bf16.mxu0 %v3073_v47  ;;  %v3155_v47 = vld [vmem:[#allocation2 + $0x4e0] ss:$16 sps:$4 sm:$0xff]  }
  0x77   :  { %1490 = vmatpush1.bf16.msra.mxu1 %v3068_v46  ;;  %v3160_v46 = vld [vmem:[#allocation2 + $0x4cc] ss:$16 sps:$4 sm:$0xff]  }
  0x78   :  { %1491 = vmatprep.subr.bf16.mxu1 %v3076_v48  ;;  %v3158_v48 = vld [vmem:[#allocation2 + $0x4c8] ss:$16 sps:$4 sm:$0xff]  }
  0x79   :  { %1330 = vmatpush1.bf16.msra.mxu0 %v3071_v49  ;;  %v3163_v49 = vld [vmem:[#allocation2 + $0x504] ss:$16 sps:$4 sm:$0xff]  }
  0x7a   :  { %1331 = vmatprep.subr.bf16.mxu0 %v3079_v51  ;;  %v3161_v51 = vld [vmem:[#allocation2 + $0x500] ss:$16 sps:$4 sm:$0xff]  }
  0x7b   :  { %1492 = vmatpush1.bf16.msra.mxu1 %v3074_v50  ;;  %v3166_v50 = vld [vmem:[#allocation2 + $0x4ec] ss:$16 sps:$4 sm:$0xff]  }
  0x7c   :  { %1493 = vmatprep.subr.bf16.mxu1 %v3082_v52  ;;  %v3164_v52 = vld [vmem:[#allocation2 + $0x4e8] ss:$16 sps:$4 sm:$0xff]  }
  0x7d   :  { %1332 = vmatpush1.bf16.msra.mxu0 %v3077_v53  ;;  %v3169_v53 = vld [vmem:[#allocation2 + $0x524] ss:$16 sps:$4 sm:$0xff]  }
  0x7e   :  { %1333 = vmatprep.subr.bf16.mxu0 %v3085_v55  ;;  %v3167_v55 = vld [vmem:[#allocation2 + $0x520] ss:$16 sps:$4 sm:$0xff]  }
  0x7f   :  { %1494 = vmatpush1.bf16.msra.mxu1 %v3080_v54  ;;  %v3172_v54 = vld [vmem:[#allocation2 + $0x50c] ss:$16 sps:$4 sm:$0xff]  }
  0x80   :  { %1495 = vmatprep.subr.bf16.mxu1 %v3088_v56  ;;  %v3170_v56 = vld [vmem:[#allocation2 + $0x508] ss:$16 sps:$4 sm:$0xff]  }
  0x81   :  { %1334 = vmatpush1.bf16.msra.mxu0 %v3083_v57  ;;  %v3175_v57 = vld [vmem:[#allocation2 + $0x544] ss:$16 sps:$4 sm:$0xff]  }
  0x82   :  { %1335 = vmatprep.subr.bf16.mxu0 %v3091_v59  ;;  %v3173_v59 = vld [vmem:[#allocation2 + $0x540] ss:$16 sps:$4 sm:$0xff]  }
  0x83   :  { %1496 = vmatpush1.bf16.msra.mxu1 %v3086_v58  ;;  %v3178_v58 = vld [vmem:[#allocation2 + $0x52c] ss:$16 sps:$4 sm:$0xff]  }
  0x84   :  { %1497 = vmatprep.subr.bf16.mxu1 %v3094_v60  ;;  %v3176_v60 = vld [vmem:[#allocation2 + $0x528] ss:$16 sps:$4 sm:$0xff]  }
  0x85   :  { %1336 = vmatpush1.bf16.msra.mxu0 %v3089_v61  ;;  %v3181_v61 = vld [vmem:[#allocation2 + $0x564] ss:$16 sps:$4 sm:$0xff]  }
  0x86   :  { %1337 = vmatprep.subr.bf16.mxu0 %v3097_v63  ;;  %v3179_v63 = vld [vmem:[#allocation2 + $0x560] ss:$16 sps:$4 sm:$0xff]  }
  0x87   :  { %1498 = vmatpush1.bf16.msra.mxu1 %v3092_v62  ;;  %v3184_v62 = vld [vmem:[#allocation2 + $0x54c] ss:$16 sps:$4 sm:$0xff]  }
  0x88   :  { %1499 = vmatprep.subr.bf16.mxu1 %v3100_v1  ;;  %v3182_v1 = vld [vmem:[#allocation2 + $0x548] ss:$16 sps:$4 sm:$0xff]  }
  0x89   :  { %1338 = vmatpush1.bf16.msra.mxu0 %v3095_v2  ;;  %v3187_v2 = vld [vmem:[#allocation2 + $0x584] ss:$16 sps:$4 sm:$0xff]  }
  0x8a   :  { %1339 = vmatprep.subr.bf16.mxu0 %v3103_v4  ;;  %v3185_v4 = vld [vmem:[#allocation2 + $0x580] ss:$16 sps:$4 sm:$0xff]  }
  0x8b   :  { %1500 = vmatpush1.bf16.msra.mxu1 %v3098_v3  ;;  %v3190_v3 = vld [vmem:[#allocation2 + $0x56c] ss:$16 sps:$4 sm:$0xff]  }
  0x8c   :  { %1501 = vmatprep.subr.bf16.mxu1 %v3106_v5  ;;  %v3188_v5 = vld [vmem:[#allocation2 + $0x568] ss:$16 sps:$4 sm:$0xff]  }
  0x8d   :  { %1340 = vmatpush1.bf16.msra.mxu0 %v3101_v6  ;;  %v3193_v6 = vld [vmem:[#allocation2 + $0x5a4] ss:$16 sps:$4 sm:$0xff]  }
  0x8e   :  { %1341 = vmatprep.subr.bf16.mxu0 %v3109_v8  ;;  %v3191_v8 = vld [vmem:[#allocation2 + $0x5a0] ss:$16 sps:$4 sm:$0xff]  }
  0x8f   :  { %1502 = vmatpush1.bf16.msra.mxu1 %v3104_v7  ;;  %v3196_v7 = vld [vmem:[#allocation2 + $0x58c] ss:$16 sps:$4 sm:$0xff]  }
  0x90   :  { %1503 = vmatprep.subr.bf16.mxu1 %v3112_v9  ;;  %v3194_v9 = vld [vmem:[#allocation2 + $0x588] ss:$16 sps:$4 sm:$0xff]  }
  0x91   :  { %1342 = vmatpush1.bf16.msra.mxu0 %v3107_v11  ;;  %v3199_v11 = vld [vmem:[#allocation2 + $0x5c4] ss:$16 sps:$4 sm:$0xff]  }
  0x92   :  { %1352 = vmatprep.subr.bf16.mxu0 %v3115_v14  ;;  %v3200_v14 = vld [vmem:[#allocation2 + $0x5a8] ss:$16 sps:$4 sm:$0xff]  }
  0x93   :  { %1504 = vmatpush1.bf16.msra.mxu1 %v3110_v13  ;;  %v3197_v13 = vld [vmem:[#allocation2 + $0x5c0] ss:$16 sps:$4 sm:$0xff]  }
  0x94   :  { %1505 = vmatprep.subr.bf16.mxu1 %v3118_v15  ;;  %1344 = vmatmul.mubr.bf16.vlgmr.msra.gmra.mrb[0].mxu0 %v63_v16  ;;  %v3205_v15 = vld [vmem:[#allocation2 + $0x5e4] ss:$16 sps:$4 sm:$0xff]  }
  0x95   :  { %1353 = vmatpush1.bf16.msra.mxu0 %v3113_v17  ;;  %1384 = vmatprep.mubr.bf16.mxu0 %v66_v22  ;;  %v3203_v17 = vld [vmem:[#allocation2 + $0x5e0] ss:$16 sps:$4 sm:$0xff]  }
  0x96   :  { %1354 = vmatprep.subr.bf16.mxu0 %v3121_v19  ;;  %v3206_v19 = vld [vmem:[#allocation2 + $0x5c8] ss:$16 sps:$4 sm:$0xff]  }
  0x97   :  { %1506 = vmatpush1.bf16.msra.mxu1 %v3116_v18  ;;  %v58_v18 = vld [vmem:[%s3858_s0 + $0x20] sm:$0xff] }
  0x98   :  { %1516 = vmatprep.subr.bf16.mxu1 %v3124_v21  ;;  %v3211_v21 = vld [vmem:[#allocation2 + $0x5ec] ss:$16 sps:$4 sm:$0xff]  }
  0x99   :  { %1355 = vmatpush1.bf16.msra.mxu0 %v3119_v23  ;;  %v3215_v23 = vld [vmem:[%s3861_s3] ss:$8 sps:$4 sm:$0xff]  }
  0x9a   :  { %1508 = vmatmul.mubr.bf16.vlgmr.msra.gmra.mrb[4].mxu1 %v63_v16  ;;  %1356 = vmatprep.subr.bf16.mxu0 %v3127_v25  ;;  %v3208_v16 = vld [vmem:[#allocation2 + $0x5cc] ss:$16 sps:$4 sm:$0xff]  }
  0x9b   :  { %1517 = vmatpush1.bf16.msra.mxu1 %v3122_v24  ;;  %1548 = vmatprep.mubr.bf16.mxu1 %v66_v22  ;;  %v65_v22 = vpack.c.bf16 %v58_v18, %v58_v18  ;;  %v3209_v24 = vld [vmem:[#allocation2 + $0x5e8] ss:$16 sps:$4 sm:$0xff]   ;;  %v3220_v25 = vld [vmem:[%s3861_s3 + $0x14] ss:$8 sps:$4 sm:$0xff]  }
  0x9c   :  { %1518 = vmatprep.subr.bf16.mxu1 %v3130_v26  ;;  %v3214_v26 = vld [vmem:[#allocation2 + $0x60c] ss:$16 sps:$4 sm:$0xff]  }
  0x9d   :  { %1357 = vmatpush1.bf16.msra.mxu0 %v3125_v27  ;;  %v3218_v27 = vld [vmem:[%s3861_s3 + $0x10] ss:$8 sps:$4 sm:$0xff]  }
  0x9e   :  { %1358 = vmatprep.subr.bf16.mxu0 %v3133_v29  ;;  %v3223_v29 = vld [vmem:[%s3861_s3 + $0x24] ss:$8 sps:$4 sm:$0xff]  }
  0x9f   :  { %1519 = vmatpush1.bf16.msra.mxu1 %v3128_v28  ;;  %v3212_v28 = vld [vmem:[#allocation2 + $0x608] ss:$16 sps:$4 sm:$0xff]  }
  0xa0   :  { %1520 = vmatprep.subr.bf16.mxu1 %v3136_v30  ;;  %v3221_v30 = vld [vmem:[%s3861_s3 + $0x20] ss:$8 sps:$4 sm:$0xff]  }
  0xa1   :  { %1359 = vmatpush1.bf16.msra.mxu0 %v3131_v31  ;;  %v3226_v31 = vld [vmem:[%s3861_s3 + $0x34] ss:$8 sps:$4 sm:$0xff]  }
  0xa2   :  { %1360 = vmatprep.subr.bf16.mxu0 %v3139_v33  ;;  %v3229_v33 = vld [vmem:[%s3861_s3 + $0x44] ss:$8 sps:$4 sm:$0xff]  }
  0xa3   :  { %1521 = vmatpush1.bf16.msra.mxu1 %v3134_v32  ;;  %v3224_v32 = vld [vmem:[%s3861_s3 + $0x30] ss:$8 sps:$4 sm:$0xff]  }
  0xa4   :  { %1522 = vmatprep.subr.bf16.mxu1 %v3142_v34  ;;  %v3232_v34 = vld [vmem:[%s3861_s3 + $0x54] ss:$8 sps:$4 sm:$0xff]  }
  0xa5   :  { %1361 = vmatpush1.bf16.msra.mxu0 %v3137_v35  ;;  %v3230_v35 = vld [vmem:[%s3861_s3 + $0x50] ss:$8 sps:$4 sm:$0xff]  }
  0xa6   :  { %1362 = vmatprep.subr.bf16.mxu0 %v3145_v37  ;;  %v3233_v37 = vld [vmem:[%s3861_s3 + $0x60] ss:$8 sps:$4 sm:$0xff]  }
  0xa7   :  { %1523 = vmatpush1.bf16.msra.mxu1 %v3140_v36  ;;  %v3235_v36 = vld [vmem:[%s3861_s3 + $0x64] ss:$8 sps:$4 sm:$0xff]  }
  0xa8   :  { %1524 = vmatprep.subr.bf16.mxu1 %v3148_v38 }
  0xa9   :  { %1363 = vmatpush1.bf16.msra.mxu0 %v3143_v39 }
  0xaa   :  { %1364 = vmatprep.subr.bf16.mxu0 %v3151_v41 }
  0xab   :  { %1525 = vmatpush1.bf16.msra.mxu1 %v3146_v40  ;;  %v3236_v40 = vld [vmem:[%s3861_s3 + $0x70] ss:$8 sps:$4 sm:$0xff]  }
  0xac   :  { %1526 = vmatprep.subr.bf16.mxu1 %v3154_v42  ;;  %v3241_v42 = vld [vmem:[%s3861_s3 + $0x84] ss:$8 sps:$4 sm:$0xff]  }
  0xad   :  { %1365 = vmatpush1.bf16.msra.mxu0 %v3149_v43 }
  0xae   :  { %1366 = vmatprep.subr.bf16.mxu0 %v3157_v45  ;;  %v3244_v45 = vld [vmem:[%s3861_s3 + $0x94] ss:$8 sps:$4 sm:$0xff]  }
  0xaf   :  { %1527 = vmatpush1.bf16.msra.mxu1 %v3152_v44  ;;  %v3239_v44 = vld [vmem:[%s3861_s3 + $0x80] ss:$8 sps:$4 sm:$0xff]  }
  0xb0   :  { %1528 = vmatprep.subr.bf16.mxu1 %v3160_v46  ;;  %v3242_v46 = vld [vmem:[%s3861_s3 + $0x90] ss:$8 sps:$4 sm:$0xff]  }
  0xb1   :  { %1367 = vmatpush1.bf16.msra.mxu0 %v3155_v47  ;;  %v3247_v47 = vld [vmem:[%s3861_s3 + $0xa4] ss:$8 sps:$4 sm:$0xff]  }
  0xb2   :  { %1368 = vmatprep.subr.bf16.mxu0 %v3163_v49  ;;  %v3250_v49 = vld [vmem:[%s3861_s3 + $0xb4] ss:$8 sps:$4 sm:$0xff]  }
  0xb3   :  { %1529 = vmatpush1.bf16.msra.mxu1 %v3158_v48  ;;  %v3245_v48 = vld [vmem:[%s3861_s3 + $0xa0] ss:$8 sps:$4 sm:$0xff]  }
  0xb4   :  { %1530 = vmatprep.subr.bf16.mxu1 %v3166_v50  ;;  %v3248_v50 = vld [vmem:[%s3861_s3 + $0xb0] ss:$8 sps:$4 sm:$0xff]  }
  0xb5   :  { %1369 = vmatpush1.bf16.msra.mxu0 %v3161_v51  ;;  %v3253_v51 = vld [vmem:[%s3861_s3 + $0xc4] ss:$8 sps:$4 sm:$0xff]  }
  0xb6   :  { %1370 = vmatprep.subr.bf16.mxu0 %v3169_v53  ;;  %v3256_v53 = vld [vmem:[%s3861_s3 + $0xd4] ss:$8 sps:$4 sm:$0xff]  }
  0xb7   :  { %1531 = vmatpush1.bf16.msra.mxu1 %v3164_v52  ;;  %v3251_v52 = vld [vmem:[%s3861_s3 + $0xc0] ss:$8 sps:$4 sm:$0xff]  }
  0xb8   :  { %1532 = vmatprep.subr.bf16.mxu1 %v3172_v54  ;;  %v3254_v54 = vld [vmem:[%s3861_s3 + $0xd0] ss:$8 sps:$4 sm:$0xff]  }
  0xb9   :  { %1371 = vmatpush1.bf16.msra.mxu0 %v3167_v55  ;;  %v3259_v55 = vld [vmem:[%s3861_s3 + $0xe4] ss:$8 sps:$4 sm:$0xff]  }
  0xba   :  { %1372 = vmatprep.subr.bf16.mxu0 %v3175_v57  ;;  %v3262_v57 = vld [vmem:[%s3861_s3 + $0xf4] ss:$8 sps:$4 sm:$0xff]  }
  0xbb   :  { %1533 = vmatpush1.bf16.msra.mxu1 %v3170_v56  ;;  %v3257_v56 = vld [vmem:[%s3861_s3 + $0xe0] ss:$8 sps:$4 sm:$0xff]  }
  0xbc   :  { %1534 = vmatprep.subr.bf16.mxu1 %v3178_v58  ;;  %v3260_v58 = vld [vmem:[%s3861_s3 + $0xf0] ss:$8 sps:$4 sm:$0xff]  }
  0xbd   :  { %1373 = vmatpush1.bf16.msra.mxu0 %v3173_v59  ;;  %v3265_v59 = vld [vmem:[%s3861_s3 + $0x104] ss:$8 sps:$4 sm:$0xff]  }
  0xbe   :  { %1374 = vmatprep.subr.bf16.mxu0 %v3181_v61  ;;  %v3312_v61 = vld [vmem:[%s3863_s5] sm:$0xff]  }
  0xbf   :  { %1535 = vmatpush1.bf16.msra.mxu1 %v3176_v60  ;;  %v3311_v60 = vld [vmem:[%s3863_s5 + $0x40] sm:$0xff]  }
  0xc0   :  { %1536 = vmatprep.subr.bf16.mxu1 %v3184_v62  ;;  %v3313_v62 = vld [vmem:[%s3863_s5 + $0x48] sm:$0xff]  }
  0xc1   :  { %1375 = vmatpush1.bf16.msra.mxu0 %v3179_v63  ;;  %v3314_v63 = vld [vmem:[%s3863_s5 + $0x8] sm:$0xff]  }
  0xc2   :  { %1376 = vmatprep.subr.bf16.mxu0 %v3187_v2  ;;  %v3316_v2 = vld [vmem:[%s3863_s5 + $0x10] sm:$0xff]  }
  0xc3   :  { %1537 = vmatpush1.bf16.msra.mxu1 %v3182_v1  ;;  %v3315_v1 = vld [vmem:[%s3863_s5 + $0x50] sm:$0xff]  }
  0xc4   :  { %1538 = vmatprep.subr.bf16.mxu1 %v3190_v3  ;;  %v3317_v3 = vld [vmem:[%s3863_s5 + $0x58] sm:$0xff]  }
  0xc5   :  { %1377 = vmatpush1.bf16.msra.mxu0 %v3185_v4  ;;  %v3318_v4 = vld [vmem:[%s3863_s5 + $0x18] sm:$0xff]  }
  0xc6   :  { %1378 = vmatprep.subr.bf16.mxu0 %v3193_v6  ;;  %v3320_v6 = vld [vmem:[%s3863_s5 + $0x20] sm:$0xff]  }
  0xc7   :  { %1539 = vmatpush1.bf16.msra.mxu1 %v3188_v5  ;;  %v3319_v5 = vld [vmem:[%s3863_s5 + $0x60] sm:$0xff]  }
  0xc8   :  { %1540 = vmatprep.subr.bf16.mxu1 %v3196_v7  ;;  %v3321_v7 = vld [vmem:[%s3863_s5 + $0x68] sm:$0xff]  }
  0xc9   :  { %1379 = vmatpush1.bf16.msra.mxu0 %v3191_v8  ;;  %v3322_v8 = vld [vmem:[%s3863_s5 + $0x28] sm:$0xff]  }
  0xca   :  { %1380 = vmatprep.subr.bf16.mxu0 %v3199_v11 }
  0xcb   :  { %1541 = vmatpush1.bf16.msra.mxu1 %v3194_v9  ;;  %v266_v9 = vlaneseq }
  0xcc   :  { %1542 = vmatprep.subr.bf16.mxu1 %v3202_v12 }
  0xcd   :  { %1381 = vmatpush1.bf16.msra.mxu0 %v3197_v13  ;;  %v3638_v11 = vshrl.u32 %v266_v9, 7  ;;  %v3644_v13 = vld [vmem:[%s3860_s2] sm:$0xf]  ;;  %v3323_v9 = vld [vmem:[%s3863_s5 + $0x70] sm:$0xff]  }
  0xce   :  { %1382 = vmatprep.subr.bf16.mxu0 %v3205_v15 }
  0xcf   :  { %1543 = vmatpush1.bf16.msra.mxu1 %v3200_v14  ;;  %v268_v12 = vsub.s32 0, %v3638_v11  ;;  %v272_v14 = vsub.s32 1, %v3638_v11 }
  0xd0   :  { %1544 = vmatprep.subr.bf16.mxu1 %v3208_v16 }
  0xd1   :  { %1383 = vmatpush1.bf16.msra.mxu0 %v3203_v17  ;;  %v269_v15 = vrot.slane %v3644_v13, %v268_v12  ;;  %v273_v16 = vrot.slane %v3644_v13, %v272_v14 }
  0xd2   :  { %2002 = vmatprep.subr.bf16.mxu0 %v3217_v20 }
  0xd3   :  { %1545 = vmatpush1.bf16.msra.mxu1 %v3206_v19 }
  0xd4   :  { %1546 = vmatprep.subr.bf16.mxu1 %v3211_v21  ;;  %1385 = vmatmul.mubr.bf16.vlgmr.msra.gmra.mrb[0].mxu0 %v65_v22 }
  0xd5   :  { %2003 = vmatpush1.bf16.msra.mxu0 %v3215_v23 }
  0xd6   :  { %2004 = vmatprep.subr.bf16.mxu0 %v3220_v25 }
  0xd7   :  { %1547 = vmatpush1.bf16.msra.mxu1 %v3209_v24 }
  0xd8   :  { %1557 = vmatprep.subr.bf16.mxu1 %v3214_v26 }
  0xd9   :  { %2005 = vmatpush1.bf16.msra.mxu0 %v3218_v27 }
  0xda   :  { %1549 = vmatmul.mubr.bf16.vlgmr.msra.gmra.mrb[4].mxu1 %v65_v22  ;;  %2006 = vmatprep.subr.bf16.mxu0 %v3223_v29 }
  0xdb   :  { %1558 = vmatpush1.bf16.msra.mxu1 %v3212_v28  ;;  %1589 = vmatprep.mubr.bf16.mxu1 %v3394_v0  ;;  %v3227_v0 = vld [vmem:[%s3861_s3 + $0x40] ss:$8 sps:$4 sm:$0xff]  }
  0xdc   :  { %2802 = vmatprep.subr.bf16.mxu1 %v3311_v60  ;;  %v3263_v28 = vld [vmem:[%s3861_s3 + $0x100] ss:$8 sps:$4 sm:$0xff]  }
  0xdd   :  { %2007 = vmatpush1.bf16.msra.mxu0 %v3221_v30  ;;  %v3268_v30 = vld [vmem:[%s3861_s3 + $0x114] ss:$8 sps:$4 sm:$0xff]   ;;  %v3299_v60 = vld [vmem:[%s3861_s3 + $0x1c0] ss:$8 sps:$4 sm:$0xff]  }
  0xde   :  { %2008 = vmatprep.subr.bf16.mxu0 %v3226_v31  ;;  %v280_v31 = vsub.s32 3, %v3638_v11 }
  0xe1   :  { %2009 = vmatpush1.bf16.msra.mxu0 %v3224_v32  ;;  %v3266_v32 = vld [vmem:[%s3861_s3 + $0x110] ss:$8 sps:$4 sm:$0xff]  }
  0xe2   :  { %2010 = vmatprep.subr.bf16.mxu0 %v3229_v33  ;;  %v3271_v33 = vld [vmem:[%s3861_s3 + $0x124] ss:$8 sps:$4 sm:$0xff]  }
  0xe5   :  { %2011 = vmatpush1.bf16.msra.mxu0 %v3227_v0  ;;  %v281_v0 = vrot.slane %v3644_v13, %v280_v31 }
  0xe6   :  { %2702 = vmatmul.mubr.msk.bf16.vlgmr.msra.gmra.mrb[4].mxu1 %vm1266_vm0, %v3474_v10  ;;  %2012 = vmatprep.subr.bf16.mxu0 %v3232_v34  ;;  %v3238_v10 = vld [vmem:[%s3861_s3 + $0x74] ss:$8 sps:$4 sm:$0xff]   ;;  %v3269_v34 = vld [vmem:[%s3861_s3 + $0x120] ss:$8 sps:$4 sm:$0xff]  }
  0xe7   :  { %2803 = vmatpush3.bf16.msra.mxu1 %v3312_v61  ;;  %v276_v61 = vsub.s32 2, %v3638_v11  ;;  %v3328_v11 = vld [vmem:[%s3865_s7 + $0x8] sm:$0xff]  }
  0xe8   :  { %2804 = vmatprep.subr.bf16.mxu1 %v3313_v62  ;;  %v3304_v62 = vld [vmem:[%s3861_s3 + $0x1d4] ss:$8 sps:$4 sm:$0xff]  }
  0xe9   :  { %2013 = vmatpush1.bf16.msra.mxu0 %v3230_v35 }
  0xea   :  { %2014 = vmatprep.subr.bf16.mxu0 %v3235_v36  ;;  %v3274_v36 = vld [vmem:[%s3861_s3 + $0x134] ss:$8 sps:$4 sm:$0xff]  }
  0xeb   :  { %2805 = vmatpush3.bf16.msra.mxu1 %v3314_v63  ;;  %v3302_v63 = vld [vmem:[%s3861_s3 + $0x1d0] ss:$8 sps:$4 sm:$0xff]  }
  0xec   :  { %2806 = vmatprep.subr.bf16.mxu1 %v3315_v1  ;;  %v277_v1 = vrot.slane %v3644_v13, %v276_v61  ;;  %v3324_v13 = vld [vmem:[%s3863_s5 + $0x30] sm:$0xff]  }
  0xed   :  { %v3544_v38 = vpop.f32.mrb[0].mxu1  ;;  %2015 = vmatpush1.bf16.msra.mxu0 %v3233_v37 }
  0xee   :  { %v3546_v39 = vpop.f32.mrb[1].mxu1  ;;  %2016 = vmatprep.subr.bf16.mxu0 %v3238_v10 }
  0xef   :  { %v1431_v41 = vpop.f32.mrb[2].mxu1  ;;  %2807 = vmatpush3.bf16.msra.mxu1 %v3316_v2  ;;  %v3307_v2 = vld [vmem:[%s3861_s3 + $0x1e4] ss:$8 sps:$4 sm:$0xff]  }
  0xf0   :  { %v1432_v43 = vpop.f32.mrb[3].mxu1  ;;  %2808 = vmatprep.subr.bf16.mxu1 %v3317_v3  ;;  %v3305_v3 = vld [vmem:[%s3861_s3 + $0x1e0] ss:$8 sps:$4 sm:$0xff]  }
  0xf1   :  { %2017 = vmatpush1.bf16.msra.mxu0 %v3236_v40  ;;  %v3272_v40 = vld [vmem:[%s3861_s3 + $0x130] ss:$8 sps:$4 sm:$0xff]  }
  0xf2   :  { %2018 = vmatprep.subr.bf16.mxu0 %v3241_v42  ;;  %v3277_v42 = vld [vmem:[%s3861_s3 + $0x144] ss:$8 sps:$4 sm:$0xff]  }
  0xf3   :  { %2809 = vmatpush3.bf16.msra.mxu1 %v3318_v4 }
  0xf4   :  { %2810 = vmatprep.subr.bf16.mxu1 %v3319_v5  ;;  %v3310_v5 = vld [vmem:[%s3861_s3 + $0x1f4] ss:$8 sps:$4 sm:$0xff]  }
  0xf5   :  { %2019 = vmatpush1.bf16.msra.mxu0 %v3239_v44  ;;  %v3275_v44 = vld [vmem:[%s3861_s3 + $0x140] ss:$8 sps:$4 sm:$0xff]  }
  0xf6   :  { %2020 = vmatprep.subr.bf16.mxu0 %v3244_v45  ;;  %v3280_v45 = vld [vmem:[%s3861_s3 + $0x154] ss:$8 sps:$4 sm:$0xff]  }
  0xf7   :  { %2811 = vmatpush3.bf16.msra.mxu1 %v3320_v6  ;;  %v3308_v6 = vld [vmem:[%s3861_s3 + $0x1f0] ss:$8 sps:$4 sm:$0xff]  }
  0xf8   :  { %2812 = vmatprep.subr.bf16.mxu1 %v3321_v7 }
  0xf9   :  { %2021 = vmatpush1.bf16.msra.mxu0 %v3242_v46  ;;  %v3278_v46 = vld [vmem:[%s3861_s3 + $0x150] ss:$8 sps:$4 sm:$0xff]  }
  0xfa   :  { %2022 = vmatprep.subr.bf16.mxu0 %v3247_v47  ;;  %v3283_v47 = vld [vmem:[%s3861_s3 + $0x164] ss:$8 sps:$4 sm:$0xff]  }
  0xfb   :  { %2813 = vmatpush3.bf16.msra.mxu1 %v3322_v8 }
  0xfc   :  { %2814 = vmatprep.subr.bf16.mxu1 %v3323_v9 }
  0xfd   :  { %2023 = vmatpush1.bf16.msra.mxu0 %v3245_v48  ;;  %v3281_v48 = vld [vmem:[%s3861_s3 + $0x160] ss:$8 sps:$4 sm:$0xff]  }
  0xfe   :  { %2024 = vmatprep.subr.bf16.mxu0 %v3250_v49  ;;  %v3286_v49 = vld [vmem:[%s3861_s3 + $0x174] ss:$8 sps:$4 sm:$0xff]  }
  0xff   :  { %2815 = vmatpush3.bf16.msra.mxu1 %v3324_v13 }
 0x101   :  { %2025 = vmatpush1.bf16.msra.mxu0 %v3248_v50  ;;  %v3284_v50 = vld [vmem:[%s3861_s3 + $0x170] ss:$8 sps:$4 sm:$0xff]  }
 0x102   :  { %2026 = vmatprep.subr.bf16.mxu0 %v3253_v51  ;;  %v3289_v51 = vld [vmem:[%s3861_s3 + $0x184] ss:$8 sps:$4 sm:$0xff]  }
 0x105   :  { %2027 = vmatpush1.bf16.msra.mxu0 %v3251_v52  ;;  %v3287_v52 = vld [vmem:[%s3861_s3 + $0x180] ss:$8 sps:$4 sm:$0xff]  }
 0x106   :  { %2028 = vmatprep.subr.bf16.mxu0 %v3256_v53  ;;  %v3292_v53 = vld [vmem:[%s3861_s3 + $0x194] ss:$8 sps:$4 sm:$0xff]  }
 0x109   :  { %2029 = vmatpush1.bf16.msra.mxu0 %v3254_v54  ;;  %v3290_v54 = vld [vmem:[%s3861_s3 + $0x190] ss:$8 sps:$4 sm:$0xff]  }
 0x10a   :  { %2030 = vmatprep.subr.bf16.mxu0 %v3259_v55  ;;  %v3295_v55 = vld [vmem:[%s3861_s3 + $0x1a4] ss:$8 sps:$4 sm:$0xff]  }
 0x10d   :  { %2031 = vmatpush1.bf16.msra.mxu0 %v3257_v56  ;;  %v3293_v56 = vld [vmem:[%s3861_s3 + $0x1a0] ss:$8 sps:$4 sm:$0xff]  }
 0x10e   :  { %2032 = vmatprep.subr.bf16.mxu0 %v3262_v57  ;;  %v3298_v57 = vld [vmem:[%s3861_s3 + $0x1b4] ss:$8 sps:$4 sm:$0xff]  }
 0x111   :  { %2033 = vmatpush1.bf16.msra.mxu0 %v3260_v58  ;;  %v3296_v58 = vld [vmem:[%s3861_s3 + $0x1b0] ss:$8 sps:$4 sm:$0xff]  }
 0x112   :  { %2043 = vmatprep.subr.bf16.mxu0 %v3265_v59  ;;  %v3301_v59 = vld [vmem:[%s3861_s3 + $0x1c4] ss:$8 sps:$4 sm:$0xff]  }
 0x1a7   :  { %v1386_v17 = vpop.f32.mrb[0].mxu0 }
 0x1a8   :  { %v2882_v18 = vadd.f32 %v1386_v17, %v269_v15  ;;  %v1388_v19 = vpop.f32.mrb[1].mxu0  ;;  %v3325_v15 = vld [vmem:[%s3863_s5 + $0x78] sm:$0xff]   ;;  %v3395_v17 = vmov 0.0  }
 0x1a9   :  { %v2884_v20 = vadd.f32 %v1388_v19, %v273_v16  ;;  %v1390_v21 = vpop.f32.mrb[2].mxu0  ;;  %v3326_v16 = vld [vmem:[%s3863_s5 + $0x38] sm:$0xff]   ;;  %2816 = vmatprep.subr.bf16.mxu1 %v3325_v15 }
 0x1aa   :  { %v2883_v22 = vadd.f32 %v2882_v18, %v3544_v38  ;;  %v1391_v23 = vpop.f32.mrb[3].mxu0  ;;  %2817 = vmatpush3.bf16.msra.mxu1 %v3326_v16  ;;  %v1670_v18 = vld [vmem:[%s3862_s4] sm:$0x3] }
 0x1ab   :  { %v2885_v24 = vadd.f32 %v2884_v20, %v3546_v39  ;;  %2842 = vmatprep.subr.bf16.mxu1 %v3395_v17  ;;  %v1675_v19 = vrot.slane %v1670_v18, %v268_v12  ;;  %v1679_v20 = vrot.slane %v1670_v18, %v272_v14  ;;  %v3329_v12 = vld [vmem:[%s3865_s7 + $0x10] sm:$0xff]   ;;  %v3330_v14 = vld [vmem:[%s3865_s7 + $0x18] sm:$0xff]  }
 0x1ac   :  { %v1598_v25 = vmax.f32 %v2883_v22, 0.0 }
 0x1ad   :  { %v1599_v26 = vmax.f32 %v2885_v24, 0.0 }
 0x1ae   :  { %v1602_v29 = vpack.c.bf16 %v1598_v25, %v1598_v25 }
 0x1af   :  { %v1603_v27 = vpack.c.bf16 %v1599_v26, %v1599_v26 }
 0x1b1   :  { %2034 = vmatprep.mubr.bf16.mxu0 %v1603_v27 }
 0x1b2   :  { %2035 = vmatmul.mubr.bf16.vlgmr.msra.gmra.mrb[4].mxu0 %v1602_v29 }
 0x1b3   :  { %2044 = vmatpush1.bf16.msra.mxu0 %v3263_v28 }
 0x1b4   :  { %2045 = vmatprep.subr.bf16.mxu0 %v3268_v30  ;;  %v3327_v30 = vld [vmem:[%s3865_s7] sm:$0xff]  }
 0x1b7   :  { %2046 = vmatpush1.bf16.msra.mxu0 %v3266_v32  ;;  %v3331_v32 = vld [vmem:[%s3865_s7 + $0x20] sm:$0xff]  }
 0x1b8   :  { %2047 = vmatprep.subr.bf16.mxu0 %v3271_v33  ;;  %v3332_v33 = vld [vmem:[%s3865_s7 + $0x28] sm:$0xff]  }
 0x1b9   :  { %v1591_v35 = vpop.f32.mrb[4].mxu1 }
 0x1ba   :  { %v1593_v37 = vpop.f32.mrb[5].mxu1  ;;  %v2886_v4 = vadd.f32 %v1591_v35, %v277_v1 }
 0x1bb   :  { %v2887_v10 = vadd.f32 %v1593_v37, %v281_v0  ;;  %v1595_v38 = vpop.f32.mrb[6].mxu1  ;;  %2048 = vmatpush1.bf16.msra.mxu0 %v3269_v34  ;;  %v3333_v0 = vld [vmem:[%s3865_s7 + $0x30] sm:$0xff]   ;;  %v3334_v34 = vld [vmem:[%s3865_s7 + $0x38] sm:$0xff]  }
 0x1bc   :  { %v1596_v39 = vpop.f32.mrb[7].mxu1  ;;  %2049 = vmatprep.subr.bf16.mxu0 %v3274_v36  ;;  %v1600_v7 = vmax.f32 %v2886_v4, 0.0  ;;  %v2767_v36 = vld [vmem:[%s3864_s6] ss:$0 sm:$0xff] }
 0x1bd   :  { %v1601_v41 = vmax.f32 %v2887_v10, 0.0 }
 0x1be   :  { %v1604_v8 = vpack.c.bf16 %v1600_v7, %v1600_v7 }
 0x1bf   :  { %v1605_v43 = vpack.c.bf16 %v1601_v41, %v1601_v41  ;;  %2050 = vmatpush1.bf16.msra.mxu0 %v3272_v40 }
 0x1c0   :  { %2051 = vmatprep.subr.bf16.mxu0 %v3277_v42  ;;  %v3335_v42 = vld [vmem:[%s3867_s9] sm:$0xff]  }
 0x1c1   :  { %2075 = vmatprep.mubr.bf16.mxu0 %v1605_v43 }
 0x1c3   :  { %2052 = vmatpush1.bf16.msra.mxu0 %v3275_v44  ;;  %v3336_v44 = vld [vmem:[%s3867_s9 + $0x8] sm:$0xff]  }
 0x1c4   :  { %2053 = vmatprep.subr.bf16.mxu0 %v3280_v45  ;;  %v3337_v45 = vld [vmem:[%s3867_s9 + $0x10] sm:$0xff]  }
 0x1c7   :  { %2054 = vmatpush1.bf16.msra.mxu0 %v3278_v46  ;;  %v3338_v46 = vld [vmem:[%s3867_s9 + $0x18] sm:$0xff]  }
 0x1c8   :  { %2055 = vmatprep.subr.bf16.mxu0 %v3283_v47  ;;  %v3339_v47 = vld [vmem:[%s3867_s9 + $0x20] sm:$0xff]  }
 0x1cb   :  { %2056 = vmatpush1.bf16.msra.mxu0 %v3281_v48  ;;  %v3340_v48 = vld [vmem:[%s3867_s9 + $0x28] sm:$0xff]  }
 0x1cc   :  { %2057 = vmatprep.subr.bf16.mxu0 %v3286_v49  ;;  %v3341_v49 = vld [vmem:[%s3867_s9 + $0x30] sm:$0xff]  }
 0x1cf   :  { %2058 = vmatpush1.bf16.msra.mxu0 %v3284_v50  ;;  %v3342_v50 = vld [vmem:[%s3867_s9 + $0x38] sm:$0xff]  }
 0x1d0   :  { %2059 = vmatprep.subr.bf16.mxu0 %v3289_v51  ;;  %v2784_v51 = vld [vmem:[%s3866_s8] ss:$0 sm:$0xff]  ;;  %s3365_s8 = scalar_lea.vmem %s2497_s26, 128 }
 0x1d1   :  { %p3366_p8 = scmp.ne.s32.totalorder %s2497_s26, %s3365_s8  ;;  %p3371_p10 = scmp.lt.s32.totalorder %s3365_s8, %s3365_s8 }
 0x1d3   :  { %2060 = vmatpush1.bf16.msra.mxu0 %v3287_v52  ;;  %p3372_p11 = por %p3371_p10, %p3370_p9 }
 0x1d4   :  { %2061 = vmatprep.subr.bf16.mxu0 %v3292_v53 }
 0x1d5   :  { %p3373_p12 = pnand %p3372_p11, %p3366_p8 }
 0x1d7   :  { %2062 = vmatpush1.bf16.msra.mxu0 %v3290_v54 }
 0x1d8   :  { %2063 = vmatprep.subr.bf16.mxu0 %v3295_v55 }
 0x1db   :  { %2064 = vmatpush1.bf16.msra.mxu0 %v3293_v56 }
 0x1dc   :  { %2065 = vmatprep.subr.bf16.mxu0 %v3298_v57 }
 0x1df   :  { %2066 = vmatpush1.bf16.msra.mxu0 %v3296_v58 }
 0x1e0   :  { %2067 = vmatprep.subr.bf16.mxu0 %v3301_v59  ;;  %v2793_v59 = vld [vmem:[%s3868_s10] ss:$0 sm:$0xff] }
 0x1e3   :  { %2068 = vmatpush1.bf16.msra.mxu0 %v3299_v60 }
 0x1e4   :  { %2069 = vmatprep.subr.bf16.mxu0 %v3304_v62 }
 0x1e7   :  { %2070 = vmatpush1.bf16.msra.mxu0 %v3302_v63 }
 0x1e8   :  { %2071 = vmatprep.subr.bf16.mxu0 %v3307_v2 }
 0x1eb   :  { %2072 = vmatpush1.bf16.msra.mxu0 %v3305_v3 }
 0x1ec   :  { %2073 = vmatprep.subr.bf16.mxu0 %v3310_v5 }
 0x1ef   :  { %2074 = vmatpush1.bf16.msra.mxu0 %v3308_v6 }
 0x1f2   :  { %2076 = vmatmul.mubr.bf16.vlgmr.msra.gmra.mrb[4].mxu0 %v1604_v8 }
 0x2c5   :  { %v2077_v21 = vpop.f32.mrb[4].mxu0 }
 0x2c6   :  { %v2888_v22 = vadd.f32 %v2077_v21, %v1675_v19  ;;  %v2079_v23 = vpop.f32.mrb[5].mxu0 }
 0x2c7   :  { %v2889_v24 = vadd.f32 %v2079_v23, %v1679_v20  ;;  %v2081_v25 = vpop.f32.mrb[6].mxu0 }
 0x2c8   :  { %v2084_v26 = vmax.f32 %v2888_v22, 0.0  ;;  %v2082_v27 = vpop.f32.mrb[7].mxu0 }
 0x2c9   :  { %v2085_v28 = vmax.f32 %v2889_v24, 0.0 }
 0x2ca   :  { %v2086_v31 = vpack.c.bf16 %v2084_v26, %v2084_v26 }
 0x2cb   :  { %v2087_v29 = vpack.c.bf16 %v2085_v28, %v2085_v28 }
 0x2cd   :  { %2255 = vmatprep.mubr.bf16.mxu1 %v2087_v29 }
 0x2ce   :  { %2256 = vmatmul.mubr.bf16.vlgmr.msra.gmra.mrb[8].mxu1 %v2086_v31 }
 0x2cf   :  { %2843 = vmatpush3.bf16.msra.mxu1 %v3327_v30  ;;  %2858 = vmatprep.mubr.msk.bf16.mxu1 %vm3396_vm1, %v3395_v17 }
 0x2d0   :  { %2844 = vmatprep.subr.bf16.mxu1 %v3395_v17 }
 0x2d3   :  { %2845 = vmatpush3.bf16.msra.mxu1 %v3328_v11 }
 0x2d4   :  { %2846 = vmatprep.subr.bf16.mxu1 %v3395_v17 }
 0x2d7   :  { %2847 = vmatpush3.bf16.msra.mxu1 %v3329_v12 }
 0x2d8   :  { %2848 = vmatprep.subr.bf16.mxu1 %v3395_v17 }
 0x2db   :  { %2849 = vmatpush3.bf16.msra.mxu1 %v3330_v14 }
 0x2dc   :  { %2850 = vmatprep.subr.bf16.mxu1 %v3395_v17 }
 0x2df   :  { %2851 = vmatpush3.bf16.msra.mxu1 %v3331_v32 }
 0x2e0   :  { %2852 = vmatprep.subr.bf16.mxu1 %v3395_v17 }
 0x2e3   :  { %2853 = vmatpush3.bf16.msra.mxu1 %v3332_v33 }
 0x2e4   :  { %2854 = vmatprep.subr.bf16.mxu1 %v3395_v17 }
 0x2e7   :  { %2855 = vmatpush3.bf16.msra.mxu1 %v3333_v0 }
 0x2e8   :  { %2856 = vmatprep.subr.bf16.mxu1 %v3395_v17 }
 0x2eb   :  { %2857 = vmatpush3.bf16.msra.mxu1 %v3334_v34 }
 0x2ec   :  { %2862 = vmatprep.subr.bf16.mxu1 %v3395_v17 }
 0x3a1   :  { %v2818_v35 = vpop.f32.mrb[8].mxu1 }
 0x3a2   :  { %v2819_v37 = vpop.f32.mrb[9].mxu1 }
 0x3a3   :  { %v2820_v10 = vadd.f32 %v2819_v37, %v2818_v35  ;;  %v2821_v38 = vpop.f32.mrb[10].mxu1 }
 0x3a4   :  { %v2822_v39 = vpop.f32.mrb[11].mxu1 }
 0x3a5   :  { %v2258_v40 = vadd.f32 %v2820_v10, %v2767_v36 }
 0x3a7   :  { %v2263_v41 = vmax.f32 %v2258_v40, 0.0 }
 0x3a9   :  { %v2264_v43 = vpack.c.bf16 %v2263_v41, %v2263_v41 }
 0x3ab   :  { %2859 = vmatmul.mubr.bf16.vlgmr.msra.gmra.mrb[12].mxu1 %v2264_v43 }
 0x3ac   :  { %2863 = vmatpush3.bf16.msra.mxu1 %v3335_v42  ;;  %2878 = vmatprep.mubr.msk.bf16.mxu1 %vm3396_vm1, %v3395_v17 }
 0x3ad   :  { %2864 = vmatprep.subr.bf16.mxu1 %v3395_v17 }
 0x3b0   :  { %2865 = vmatpush3.bf16.msra.mxu1 %v3336_v44 }
 0x3b1   :  { %2866 = vmatprep.subr.bf16.mxu1 %v3395_v17 }
 0x3b4   :  { %2867 = vmatpush3.bf16.msra.mxu1 %v3337_v45 }
 0x3b5   :  { %2868 = vmatprep.subr.bf16.mxu1 %v3395_v17 }
 0x3b8   :  { %2869 = vmatpush3.bf16.msra.mxu1 %v3338_v46 }
 0x3b9   :  { %2870 = vmatprep.subr.bf16.mxu1 %v3395_v17 }
 0x3bc   :  { %2871 = vmatpush3.bf16.msra.mxu1 %v3339_v47 }
 0x3bd   :  { %2872 = vmatprep.subr.bf16.mxu1 %v3395_v17 }
 0x3c0   :  { %2873 = vmatpush3.bf16.msra.mxu1 %v3340_v48 }
 0x3c1   :  { %2874 = vmatprep.subr.bf16.mxu1 %v3395_v17 }
 0x3c4   :  { %2875 = vmatpush3.bf16.msra.mxu1 %v3341_v49 }
 0x3c5   :  { %2876 = vmatprep.subr.bf16.mxu1 %v3395_v17 }
 0x3c8   :  { %2877 = vmatpush3.bf16.msra.mxu1 %v3342_v50 }
 0x47e   :  { %v2370_v52 = vpop.f32.mrb[12].mxu1 }
 0x47f   :  { %v2371_v53 = vadd.f32 %v2784_v51, %v2370_v52  ;;  %v2860_v54 = vpop.f32.mrb[13].mxu1 }
 0x480   :  { %v2373_v55 = vpop.f32.mrb[14].mxu1 }
 0x481   :  { %v2376_v56 = vmax.f32 %v2371_v53, 0.0  ;;  %v2861_v57 = vpop.f32.mrb[15].mxu1 }
 0x483   :  { %v2377_v58 = vpack.c.bf16 %v2376_v56, %v2376_v56 }
 0x485   :  { %2879 = vmatmul.mubr.bf16.vlgmr.msra.gmra.mrb[16].mxu1 %v2377_v58 }
 0x558   :  { %v2483_v60 = vpop.f32.mrb[16].mxu1 }
 0x559   :  { %v2484_v61 = vadd.f32 %v2793_v59, %v2483_v60  ;;  %v2880_v62 = vpop.f32.mrb[17].mxu1 }
 0x55a   :  { %v2486_v63 = vpop.f32.mrb[18].mxu1 }
 0x55b   :  { %2489 = vst [vmem:[#allocation5] sm:$0xff] %v2484_v61  ;;  %v2881_v1 = vpop.f32.mrb[19].mxu1 }
 0x55c   :  { %3376 = shalt.err (!%p3373_p12)
}
 0x55d   :  { %s3377_s10 = scalar_lea.hbm %s3869_s11, 128 }
 0x55e   :  { %p3378_p13 = scmp.ne.s32.totalorder %s3869_s11, %s3377_s10  ;;  %p3381_p0 = scmp.lt.u32.totalorder %s3377_s10, %s3869_s11 }
 0x560   :  { %p3383_p1 = pnand %p3381_p0, %p3378_p13 }
 0x562   :  { %3386 = shalt.err (!%p3383_p1)
}
 0x563   :  { %2499 = dma.vmem_to_hbm [thread:$0]  %s2497_s26, 128, %s3869_s11, [#allocation4]  }
 0x564   :  { %3389 = dma.done.wait [#allocation4], 128  }
 0x565   :  { %3390 = vsyncadd [#allocation4], 4294967168 }
 0x566   :  { %2503 = vsyncpa [#allocation3], 1 }
 0x567   :  { %2504 = vsyncpa [#allocation4], 1 }

</bundles_post_ra>
